<compile_context>
chip_gen: v7x
topology: tpu7x:2x2x1
jax: 0.10.0
libtpu: 0.0.40
codegen_flags: <defaults>
</compile_context>

<pallas_src>
import functools
import math

import jax
import jax.numpy as jnp
from jax.experimental import pallas as pl
from jax.experimental.pallas import tpu as pltpu


def _round_up(x, m):
    return (x + m - 1) // m * m


def _choose_tiling(bt, seq_len, row_cap):
    """Rows per tile: a multiple of lcm(T, 128) so the k=3 halo never crosses a
    tile boundary and loads/stores stay (8,128)-aligned; capped so one tile's
    VMEM footprint (~4-5 KiB/row incl. double buffering) stays well inside
    v7x's 64 MiB physical VMEM and v5e's scoped limit."""
    lcm = seq_len * 128 // math.gcd(seq_len, 128)
    tile_rows = max(lcm, (row_cap // lcm) * lcm)      # largest multiple of lcm <= cap
    tile_rows = min(tile_rows, _round_up(bt, lcm))    # never bigger than (padded) data
    m_pad = _round_up(bt, tile_rows)
    return tile_rows, m_pad


def _shift_rows(v, delta):
    """Row shift with zero fill: delta=+1 -> row t holds v[t-1]; delta=-1 -> v[t+1].
    Explicit slice+concat keeps semantics unambiguous and lowers on every backend;
    pltpu.roll(v, shift>=0, axis=0) (XLU) is an equivalent alternative."""
    c = v.shape[-1]
    pad = jnp.zeros((abs(delta), c), v.dtype)
    if delta > 0:
        return jnp.concatenate([pad, v[:-delta, :]], axis=0)
    return jnp.concatenate([v[-delta:, :], pad], axis=0)


def _tokenize_kernel(x_ref, w1_ref, b1_ref, w2_ref, b2_ref, wsim_ref, bsim_ref,
                     tok_ref, *, seq_len):
    """One (tile_rows, Din) row-tile of the flattened (B*T, D_mel) problem.

    x_ref    : (M, Din)    f32 mel rows (channels-last), zero padded
    w1_ref   : (3*Din, H)  stacked k=3 conv-1 weights [w[t-1]; w[t]; w[t+1]]
    w2_ref   : (3*H, H)    stacked k=3 conv-2 weights
    wsim_ref : (H, N)      = wp @ wq @ normalize(codebook)^T   (pre-folded)
    bsim_ref : (1, N)      = (bp @ wq + bq) @ normalize(codebook)^T
    tok_ref  : (1, M)      int32 token ids (lane-dense store)
    """
    x = x_ref[...].astype(jnp.float32)                       # (M, Din)
    m = x.shape[0]

    # Sequence-boundary masks for the k=3 halo: batch*time is flattened into
    # rows and tile_rows % seq_len == 0, so row-in-tile % seq_len equals the
    # frame index within its sequence for every grid step.
    t_in_seq = jax.lax.broadcasted_iota(jnp.int32, (m, 1), 0) % seq_len
    is_first = t_in_seq == 0
    is_last = t_in_seq == (seq_len - 1)

    def conv3(v, w_ref, b_ref):
        # 'same' (pad=1) Conv1d over time: three accumulating MXU dots against
        # statically sliced (sublane-aligned) weight blocks; masks keep the
        # halo zero at sequence boundaries inside the flattened row slab.
        c = v.shape[-1]
        dt = w_ref.dtype                                      # bf16 fast path or f32
        v_m1 = jnp.where(is_first, 0.0, _shift_rows(v, 1))    # v[t-1]
        v_p1 = jnp.where(is_last, 0.0, _shift_rows(v, -1))    # v[t+1]
        acc = jnp.dot(v_m1.astype(dt), w_ref[0:c, :],
                      preferred_element_type=jnp.float32)
        acc = acc + jnp.dot(v.astype(dt), w_ref[c:2 * c, :],
                            preferred_element_type=jnp.float32)
        acc = acc + jnp.dot(v_p1.astype(dt), w_ref[2 * c:3 * c, :],
                            preferred_element_type=jnp.float32)
        return acc + b_ref[...]                               # bias add in f32

    # ---------------- encoder: Conv1d(k=3) -> GELU -> Conv1d(k=3) -> GELU ----
    # TODO(synk): torch.nn.GELU defaults to the exact erf form; tanh approx here.
    h = jax.nn.gelu(conv3(x, w1_ref, b1_ref), approximate=True)     # (M, H)
    h = jax.nn.gelu(conv3(h, w2_ref, b2_ref), approximate=True)     # (M, H)

    # ------------- encoder 1x1 projection + quantizer.tokenize, one dot -------
    # argmax_n <normalize((h@wp+bp)@wq + bq), normalize(cb)_n>
    #   == argmax_n (h @ (wp @ wq @ cb_n^T) + (bp @ wq + bq) @ cb_n^T)
    # (the positive per-row latent norm cannot change the argmax, so it is
    #  dropped; codebook normalization and both projections are pre-folded).
    sim = jnp.dot(h.astype(wsim_ref.dtype), wsim_ref[...],
                  preferred_element_type=jnp.float32) + bsim_ref[...]   # (M, N)

    n_codes = sim.shape[-1]
    max_sim = jnp.max(sim, axis=-1, keepdims=True)
    col = jax.lax.broadcasted_iota(jnp.int32, sim.shape, 1)
    # first-occurrence tie-break, like torch argmax
    idx = jnp.min(jnp.where(sim >= max_sim, col, n_codes), axis=-1)     # (M,)
    idx = jnp.minimum(idx, n_codes - 1)       # NaN guard: never emit an OOB id
    tok_ref[...] = idx[None, :].astype(jnp.int32)                       # (1, M)


@functools.partial(jax.jit, static_argnames=("matmul_dtype", "row_cap"))
def speaker_encoder_tokenize(mels, params, *, matmul_dtype=jnp.float32,
                             row_cap=2048):
    """mels: (B, T, D_mel) float32  ->  speaker token ids (B, T) int32.

    matmul_dtype=jnp.bfloat16 enables the bf16 MXU fast path (f32 accumulate);
    keep the default f32 when bit-exact agreement with an f32 reference matters.
    """
    B, T, Din = mels.shape
    w1, b1, w2, b2 = params["w1"], params["b1"], params["w2"], params["b2"]
    wp, bp, wq, bq, cb = (params["wp"], params["bp"], params["wq"],
                          params["bq"], params["codebook"])
    H = w1.shape[-1]

    # ---- one-time constant folding (cached by jit, hoisted off the grid) ----
    cb_n = cb / jnp.maximum(jnp.linalg.norm(cb, axis=-1, keepdims=True), 1e-12)
    proj = wq @ cb_n.T                                   # (Dz, N): in_project folded
    wsim = (wp @ proj).astype(matmul_dtype)              # (H, N): encoder proj folded
    bsim = (bp @ proj + bq @ cb_n.T).astype(jnp.float32)  # (1, N), added post-dot
    w1c = w1.reshape(3 * Din, H).astype(matmul_dtype)     # stacked k=3 conv weights
    w2c = w2.reshape(3 * H, H).astype(matmul_dtype)
    b1f = b1.astype(jnp.float32)
    b2f = b2.astype(jnp.float32)

    # ---- flatten batch*time into a lane-/sublane-friendly row slab, tile it ----
    BT = B * T
    tile_rows, m_pad = _choose_tiling(BT, T, row_cap)
    x = mels.reshape(BT, Din).astype(jnp.float32)
    if m_pad != BT:
        x = jnp.pad(x, ((0, m_pad - BT), (0, 0)))
    grid = (m_pad // tile_rows,)

    full = lambda a: pl.BlockSpec(a.shape, lambda g: (0,) * a.ndim)

    tokens = pl.pallas_call(
        functools.partial(_tokenize_kernel, seq_len=T),
        out_shape=jax.ShapeDtypeStruct((1, m_pad), jnp.int32),
        grid_spec=pltpu.PrefetchScalarGridSpec(
            num_scalar_prefetch=0,
            grid=grid,
            in_specs=[
                pl.BlockSpec((tile_rows, Din), lambda g: (g, 0)),   # mel rows
                full(w1c), full(b1f), full(w2c), full(b2f),
                full(wsim), full(bsim),
            ],
            # (1, tile_rows) blocks on a (1, m_pad) array: first block dim equals
            # the full array dim, last dim is a multiple of 128 (lane-dense store)
            # -> valid for any grid size.
            out_specs=pl.BlockSpec((1, tile_rows), lambda g: (0, g)),
        ),
        compiler_params=pltpu.CompilerParams(
            # Row tiles are independent -> megacore-shardable on v7x, harmless
            # on single-TC v5e/v6e; explicit VMEM limit covers v5e's 16 MiB
            # default scoped limit while staying under v7x's 64 MiB physical.
            dimension_semantics=("parallel",),
            vmem_limit_bytes=48 * 1024 * 1024,
        ),
    )(x, w1c, b1f, w2c, b2f, wsim, bsim)

    return tokens.reshape(m_pad)[:BT].reshape(B, T)


def _reference(mels, params):
    """Pure-JAX mirror of the module's forward pass (unfused, spec-mirroring)."""
    w1, b1, w2, b2 = params["w1"], params["b1"], params["w2"], params["b2"]
    wp, bp, wq, bq, cb = (params["wp"], params["bp"], params["wq"],
                          params["bq"], params["codebook"])

    def conv3(x, w, b):   # x: (B, T, Cin), 'same' pad=1 Conv1d over time
        xp = jnp.pad(x, ((0, 0), (1, 1), (0, 0)))
        return (xp[:, :-2] @ w[0] + xp[:, 1:-1] @ w[1] + xp[:, 2:] @ w[2]) + b

    h = jax.nn.gelu(conv3(mels, w1, b1), approximate=True)
    h = jax.nn.gelu(conv3(h, w2, b2), approximate=True)
    z = h @ wp + bp                               # encoder output latent
    lat = z @ wq + bq                             # quantizer in_project
    lat_n = lat / jnp.maximum(jnp.linalg.norm(lat, axis=-1, keepdims=True), 1e-12)
    cb_n = cb / jnp.maximum(jnp.linalg.norm(cb, axis=-1, keepdims=True), 1e-12)
    sim = jnp.einsum("btd,nd->btn", lat_n, cb_n)
    return jnp.argmax(sim, axis=-1).astype(jnp.int32), sim


def _init_params(key, d_in, hidden, d_z, d_code, n_codes):
    ks = jax.random.split(key, 9)
    s = 0.05
    return {
        "w1": s * jax.random.normal(ks[0], (3, d_in, hidden), jnp.float32),
        "b1": s * jax.random.normal(ks[1], (1, hidden), jnp.float32),
        "w2": s * jax.random.normal(ks[2], (3, hidden, hidden), jnp.float32),
        "b2": s * jax.random.normal(ks[3], (1, hidden), jnp.float32),
        "wp": s * jax.random.normal(ks[4], (hidden, d_z), jnp.float32),
        "bp": s * jax.random.normal(ks[5], (1, d_z), jnp.float32),
        "wq": s * jax.random.normal(ks[6], (d_z, d_code), jnp.float32),
        "bq": s * jax.random.normal(ks[7], (1, d_code), jnp.float32),
        "codebook": jax.random.normal(ks[8], (n_codes, d_code), jnp.float32),
    }


def _check(tokens, ref_tok, ref_sim):
    agree = tokens == ref_tok
    if bool(jnp.all(agree)):
        return
    # Re-associated matmuls (folded wp/wq/codebook, dropped positive row norm)
    # may only flip tokens on genuine near-ties of the reference similarity.
    top2 = jnp.sort(ref_sim, axis=-1)
    gap = top2[..., -1] - top2[..., -2]
    assert bool(jnp.all(agree | (gap < 5e-3))), "token mismatch beyond near-tie"


if __name__ == "__main__":
    D_IN, HIDDEN, D_Z = 32, 64, 32      # mel features / encoder widths
    D_CODE, N_CODES = 8, 128            # factorized-VQ codebook

    root = jax.random.PRNGKey(0)
    k_params, k_small, k_long = jax.random.split(root, 3)
    params = _init_params(k_params, D_IN, HIDDEN, D_Z, D_CODE, N_CODES)

    # Small case: single grid step, exact-precision (f32) MXU path.
    B, T = 2, 16
    mels = jax.random.normal(k_small, (B, T, D_IN), jnp.float32)
    tokens = jax.block_until_ready(speaker_encoder_tokenize(mels, params))
    assert tokens.shape == (B, T), tokens.shape
    assert tokens.dtype == jnp.int32, tokens.dtype
    ref_tok, ref_sim = _reference(mels, params)
    _check(tokens, ref_tok, ref_sim)

    # bf16-MXU fast path (f32 accumulate): shape/dtype check only, since near-tie
    # tokens may legitimately flip versus the f32 reference.
    tok_bf16 = jax.block_until_ready(
        speaker_encoder_tokenize(mels, params, matmul_dtype=jnp.bfloat16))
    assert tok_bf16.shape == (B, T) and tok_bf16.dtype == jnp.int32

    # Longer case: exercises grid > 1 (parallel row tiles + pipelined DMA) and
    # the sequence-boundary masking at tile edges.
    B2, T2 = 2, 1280
    mels2 = jax.random.normal(k_long, (B2, T2, D_IN), jnp.float32)
    tokens2 = jax.block_until_ready(speaker_encoder_tokenize(mels2, params))
    assert tokens2.shape == (B2, T2) and tokens2.dtype == jnp.int32
    ref_tok2, ref_sim2 = _reference(mels2, params)
    _check(tokens2, ref_tok2, ref_sim2)

    print("KERNEL_OK")
</pallas_src>

<mosaic_0001>
module attributes {stable_mosaic.version = 11 : i64} {
  func.func @_tokenize_kernel(%arg0: i32, %arg1: memref<128x32xf32, #tpu.memory_space<vmem>>, %arg2: memref<96x64xf32, #tpu.memory_space<vmem>>, %arg3: memref<1x64xf32, #tpu.memory_space<vmem>>, %arg4: memref<192x64xf32, #tpu.memory_space<vmem>>, %arg5: memref<1x64xf32, #tpu.memory_space<vmem>>, %arg6: memref<64x128xf32, #tpu.memory_space<vmem>>, %arg7: memref<1x128xf32, #tpu.memory_space<vmem>>, %arg8: memref<1x128xi32, #tpu.memory_space<vmem>>) attributes {dimension_semantics = [#tpu.dimension_semantics<parallel>], iteration_bounds = array<i64: 1>, scalar_prefetch = 0 : i64, scratch_operands = 0 : i64, tpu.core_type = #tpu.core_type<tc>, window_params = [{transform_indices = @transform_0, window_bounds = array<i64: 128, 32>}, {pipeline_mode = #tpu.pipeline_mode<synchronous>, transform_indices = @transform_1, window_bounds = array<i64: 96, 64>}, {pipeline_mode = #tpu.pipeline_mode<synchronous>, transform_indices = @transform_2, window_bounds = array<i64: 1, 64>}, {pipeline_mode = #tpu.pipeline_mode<synchronous>, transform_indices = @transform_3, window_bounds = array<i64: 192, 64>}, {pipeline_mode = #tpu.pipeline_mode<synchronous>, transform_indices = @transform_4, window_bounds = array<i64: 1, 64>}, {pipeline_mode = #tpu.pipeline_mode<synchronous>, transform_indices = @transform_5, window_bounds = array<i64: 64, 128>}, {pipeline_mode = #tpu.pipeline_mode<synchronous>, transform_indices = @transform_6, window_bounds = array<i64: 1, 128>}, {transform_indices = @transform_7, window_bounds = array<i64: 1, 128>}]} {
    %c0 = arith.constant 0 : index
    %c0_0 = arith.constant 0 : index
    %0 = vector.load %arg1[%c0, %c0_0] : memref<128x32xf32, #tpu.memory_space<vmem>>, vector<128x32xf32>
    %1 = tpu.iota {dimensions = array<i32: 0>} : vector<128x1xi32>
    %c16_i32 = arith.constant 16 : i32
    %c0_i32 = arith.constant 0 : i32
    %2 = arith.cmpi eq, %c16_i32, %c0_i32 : i32
    %c1_i32 = arith.constant 1 : i32
    %3 = arith.select %2, %c1_i32, %c16_i32 : i32
    %4 = vector.broadcast %3 : i32 to vector<128x1xi32>
    %5 = arith.remsi %1, %4 : vector<128x1xi32>
    %c0_i32_1 = arith.constant 0 : i32
    %6 = vector.broadcast %c0_i32_1 : i32 to vector<128x1xi32>
    %7 = arith.cmpi ne, %5, %6 : vector<128x1xi32>
    %c0_i32_2 = arith.constant 0 : i32
    %8 = vector.broadcast %c0_i32_2 : i32 to vector<128x1xi32>
    %9 = arith.cmpi slt, %5, %8 : vector<128x1xi32>
    %c0_i32_3 = arith.constant 0 : i32
    %10 = arith.cmpi slt, %3, %c0_i32_3 : i32
    %11 = vector.broadcast %10 : i1 to vector<128x1xi1>
    %12 = vector.broadcast %11 : vector<128x1xi1> to vector<128x1xi1>
    %13 = arith.xori %9, %12 : vector<128x1xi1>
    %14 = arith.andi %13, %7 : vector<128x1xi1>
    %15 = vector.broadcast %3 : i32 to vector<128x1xi32>
    %16 = arith.addi %5, %15 : vector<128x1xi32>
    %17 = arith.select %14, %16, %5 : vector<128x1xi1>, vector<128x1xi32>
    %c0_i32_4 = arith.constant 0 : i32
    %18 = vector.broadcast %c0_i32_4 : i32 to vector<128x1xi32>
    %19 = arith.cmpi eq, %17, %18 : vector<128x1xi32>
    %c15_i32 = arith.constant 15 : i32
    %20 = vector.broadcast %c15_i32 : i32 to vector<128x1xi32>
    %21 = arith.cmpi eq, %17, %20 : vector<128x1xi32>
    %cst = arith.constant 0.000000e+00 : f32
    %22 = vector.broadcast %cst : f32 to vector<1x32xf32>
    %23 = vector.extract_strided_slice %0 {offsets = [0, 0], sizes = [127, 32], strides = [1, 1]} : vector<128x32xf32> to vector<127x32xf32>
    %24 = tpu.concatenate %22, %23 in 0 : vector<1x32xf32>, vector<127x32xf32> -> vector<128x32xf32>
    %cst_5 = arith.constant 0.000000e+00 : f32
    %25 = vector.shape_cast %19 : vector<128x1xi1> to vector<128x1xi1>
    %26 = vector.broadcast %25 : vector<128x1xi1> to vector<128x32xi1>
    %27 = vector.broadcast %cst_5 : f32 to vector<128x32xf32>
    %28 = arith.select %26, %27, %24 : vector<128x32xi1>, vector<128x32xf32>
    %cst_6 = arith.constant 0.000000e+00 : f32
    %29 = vector.broadcast %cst_6 : f32 to vector<1x32xf32>
    %30 = vector.extract_strided_slice %0 {offsets = [1, 0], sizes = [127, 32], strides = [1, 1]} : vector<128x32xf32> to vector<127x32xf32>
    %31 = tpu.concatenate %30, %29 in 0 : vector<127x32xf32>, vector<1x32xf32> -> vector<128x32xf32>
    %cst_7 = arith.constant 0.000000e+00 : f32
    %32 = vector.shape_cast %21 : vector<128x1xi1> to vector<128x1xi1>
    %33 = vector.broadcast %32 : vector<128x1xi1> to vector<128x32xi1>
    %34 = vector.broadcast %cst_7 : f32 to vector<128x32xf32>
    %35 = arith.select %33, %34, %31 : vector<128x32xi1>, vector<128x32xf32>
    %c0_8 = arith.constant 0 : index
    %c0_9 = arith.constant 0 : index
    %36 = vector.load %arg2[%c0_8, %c0_9] : memref<96x64xf32, #tpu.memory_space<vmem>>, vector<32x64xf32>
    %cst_10 = arith.constant dense<0.000000e+00> : vector<128x64xf32>
    %37 = tpu.matmul %28, %36, %cst_10 {dimension_numbers = #tpu.dot_dimension_numbers<[1], [0], [0], [1], [0, 0, 1, 1], [], []>} : vector<128x32xf32>, vector<32x64xf32>, vector<128x64xf32> -> vector<128x64xf32>
    %c32 = arith.constant 32 : index
    %c0_11 = arith.constant 0 : index
    %38 = vector.load %arg2[%c32, %c0_11] : memref<96x64xf32, #tpu.memory_space<vmem>>, vector<32x64xf32>
    %cst_12 = arith.constant dense<0.000000e+00> : vector<128x64xf32>
    %39 = tpu.matmul %0, %38, %cst_12 {dimension_numbers = #tpu.dot_dimension_numbers<[1], [0], [0], [1], [0, 0, 1, 1], [], []>} : vector<128x32xf32>, vector<32x64xf32>, vector<128x64xf32> -> vector<128x64xf32>
    %40 = arith.addf %37, %39 : vector<128x64xf32>
    %c64 = arith.constant 64 : index
    %c0_13 = arith.constant 0 : index
    %41 = vector.load %arg2[%c64, %c0_13] : memref<96x64xf32, #tpu.memory_space<vmem>>, vector<32x64xf32>
    %cst_14 = arith.constant dense<0.000000e+00> : vector<128x64xf32>
    %42 = tpu.matmul %35, %41, %cst_14 {dimension_numbers = #tpu.dot_dimension_numbers<[1], [0], [0], [1], [0, 0, 1, 1], [], []>} : vector<128x32xf32>, vector<32x64xf32>, vector<128x64xf32> -> vector<128x64xf32>
    %43 = arith.addf %40, %42 : vector<128x64xf32>
    %c0_15 = arith.constant 0 : index
    %c0_16 = arith.constant 0 : index
    %44 = vector.load %arg3[%c0_15, %c0_16] : memref<1x64xf32, #tpu.memory_space<vmem>>, vector<1x64xf32>
    %45 = vector.broadcast %44 : vector<1x64xf32> to vector<128x64xf32>
    %46 = arith.addf %43, %45 : vector<128x64xf32>
    %47 = arith.mulf %46, %46 : vector<128x64xf32>
    %48 = arith.mulf %46, %47 : vector<128x64xf32>
    %cst_17 = arith.constant 4.471500e-02 : f32
    %49 = vector.broadcast %cst_17 : f32 to vector<128x64xf32>
    %50 = arith.mulf %49, %48 : vector<128x64xf32>
    %51 = arith.addf %46, %50 : vector<128x64xf32>
    %cst_18 = arith.constant 0.797884583 : f32
    %52 = vector.broadcast %cst_18 : f32 to vector<128x64xf32>
    %53 = arith.mulf %52, %51 : vector<128x64xf32>
    %54 = math.tanh %53 : vector<128x64xf32>
    %cst_19 = arith.constant 1.000000e+00 : f32
    %55 = vector.broadcast %cst_19 : f32 to vector<128x64xf32>
    %56 = arith.addf %55, %54 : vector<128x64xf32>
    %cst_20 = arith.constant 5.000000e-01 : f32
    %57 = vector.broadcast %cst_20 : f32 to vector<128x64xf32>
    %58 = arith.mulf %57, %56 : vector<128x64xf32>
    %59 = arith.mulf %46, %58 : vector<128x64xf32>
    %cst_21 = arith.constant 0.000000e+00 : f32
    %60 = vector.broadcast %cst_21 : f32 to vector<1x64xf32>
    %61 = vector.extract_strided_slice %59 {offsets = [0, 0], sizes = [127, 64], strides = [1, 1]} : vector<128x64xf32> to vector<127x64xf32>
    %62 = tpu.concatenate %60, %61 in 0 : vector<1x64xf32>, vector<127x64xf32> -> vector<128x64xf32>
    %cst_22 = arith.constant 0.000000e+00 : f32
    %63 = vector.shape_cast %19 : vector<128x1xi1> to vector<128x1xi1>
    %64 = vector.broadcast %63 : vector<128x1xi1> to vector<128x64xi1>
    %65 = vector.broadcast %cst_22 : f32 to vector<128x64xf32>
    %66 = arith.select %64, %65, %62 : vector<128x64xi1>, vector<128x64xf32>
    %cst_23 = arith.constant 0.000000e+00 : f32
    %67 = vector.broadcast %cst_23 : f32 to vector<1x64xf32>
    %68 = vector.extract_strided_slice %59 {offsets = [1, 0], sizes = [127, 64], strides = [1, 1]} : vector<128x64xf32> to vector<127x64xf32>
    %69 = tpu.concatenate %68, %67 in 0 : vector<127x64xf32>, vector<1x64xf32> -> vector<128x64xf32>
    %cst_24 = arith.constant 0.000000e+00 : f32
    %70 = vector.shape_cast %21 : vector<128x1xi1> to vector<128x1xi1>
    %71 = vector.broadcast %70 : vector<128x1xi1> to vector<128x64xi1>
    %72 = vector.broadcast %cst_24 : f32 to vector<128x64xf32>
    %73 = arith.select %71, %72, %69 : vector<128x64xi1>, vector<128x64xf32>
    %c0_25 = arith.constant 0 : index
    %c0_26 = arith.constant 0 : index
    %74 = vector.load %arg4[%c0_25, %c0_26] : memref<192x64xf32, #tpu.memory_space<vmem>>, vector<64x64xf32>
    %cst_27 = arith.constant dense<0.000000e+00> : vector<128x64xf32>
    %75 = tpu.matmul %66, %74, %cst_27 {dimension_numbers = #tpu.dot_dimension_numbers<[1], [0], [0], [1], [0, 0, 1, 1], [], []>} : vector<128x64xf32>, vector<64x64xf32>, vector<128x64xf32> -> vector<128x64xf32>
    %c64_28 = arith.constant 64 : index
    %c0_29 = arith.constant 0 : index
    %76 = vector.load %arg4[%c64_28, %c0_29] : memref<192x64xf32, #tpu.memory_space<vmem>>, vector<64x64xf32>
    %cst_30 = arith.constant dense<0.000000e+00> : vector<128x64xf32>
    %77 = tpu.matmul %59, %76, %cst_30 {dimension_numbers = #tpu.dot_dimension_numbers<[1], [0], [0], [1], [0, 0, 1, 1], [], []>} : vector<128x64xf32>, vector<64x64xf32>, vector<128x64xf32> -> vector<128x64xf32>
    %78 = arith.addf %75, %77 : vector<128x64xf32>
    %c128 = arith.constant 128 : index
    %c0_31 = arith.constant 0 : index
    %79 = vector.load %arg4[%c128, %c0_31] : memref<192x64xf32, #tpu.memory_space<vmem>>, vector<64x64xf32>
    %cst_32 = arith.constant dense<0.000000e+00> : vector<128x64xf32>
    %80 = tpu.matmul %73, %79, %cst_32 {dimension_numbers = #tpu.dot_dimension_numbers<[1], [0], [0], [1], [0, 0, 1, 1], [], []>} : vector<128x64xf32>, vector<64x64xf32>, vector<128x64xf32> -> vector<128x64xf32>
    %81 = arith.addf %78, %80 : vector<128x64xf32>
    %c0_33 = arith.constant 0 : index
    %c0_34 = arith.constant 0 : index
    %82 = vector.load %arg5[%c0_33, %c0_34] : memref<1x64xf32, #tpu.memory_space<vmem>>, vector<1x64xf32>
    %83 = vector.broadcast %82 : vector<1x64xf32> to vector<128x64xf32>
    %84 = arith.addf %81, %83 : vector<128x64xf32>
    %85 = arith.mulf %84, %84 : vector<128x64xf32>
    %86 = arith.mulf %84, %85 : vector<128x64xf32>
    %cst_35 = arith.constant 4.471500e-02 : f32
    %87 = vector.broadcast %cst_35 : f32 to vector<128x64xf32>
    %88 = arith.mulf %87, %86 : vector<128x64xf32>
    %89 = arith.addf %84, %88 : vector<128x64xf32>
    %cst_36 = arith.constant 0.797884583 : f32
    %90 = vector.broadcast %cst_36 : f32 to vector<128x64xf32>
    %91 = arith.mulf %90, %89 : vector<128x64xf32>
    %92 = math.tanh %91 : vector<128x64xf32>
    %cst_37 = arith.constant 1.000000e+00 : f32
    %93 = vector.broadcast %cst_37 : f32 to vector<128x64xf32>
    %94 = arith.addf %93, %92 : vector<128x64xf32>
    %cst_38 = arith.constant 5.000000e-01 : f32
    %95 = vector.broadcast %cst_38 : f32 to vector<128x64xf32>
    %96 = arith.mulf %95, %94 : vector<128x64xf32>
    %97 = arith.mulf %84, %96 : vector<128x64xf32>
    %c0_39 = arith.constant 0 : index
    %c0_40 = arith.constant 0 : index
    %98 = vector.load %arg6[%c0_39, %c0_40] : memref<64x128xf32, #tpu.memory_space<vmem>>, vector<64x128xf32>
    %cst_41 = arith.constant dense<0.000000e+00> : vector<128x128xf32>
    %99 = tpu.matmul %97, %98, %cst_41 {dimension_numbers = #tpu.dot_dimension_numbers<[1], [0], [0], [1], [0, 0, 1, 1], [], []>} : vector<128x64xf32>, vector<64x128xf32>, vector<128x128xf32> -> vector<128x128xf32>
    %c0_42 = arith.constant 0 : index
    %c0_43 = arith.constant 0 : index
    %100 = vector.load %arg7[%c0_42, %c0_43] : memref<1x128xf32, #tpu.memory_space<vmem>>, vector<1x128xf32>
    %101 = vector.broadcast %100 : vector<1x128xf32> to vector<128x128xf32>
    %102 = arith.addf %99, %101 : vector<128x128xf32>
    %cst_44 = arith.constant dense<0xFF800000> : vector<128xf32>
    %103 = vector.multi_reduction <maximumf>, %102, %cst_44 [1] : vector<128x128xf32> to vector<128xf32>
    %104 = vector.shape_cast %103 : vector<128xf32> to vector<128x1xf32>
    %105 = tpu.iota {dimensions = array<i32: 1>} : vector<128x128xi32>
    %106 = vector.broadcast %104 : vector<128x1xf32> to vector<128x128xf32>
    %107 = arith.cmpf oge, %102, %106 : vector<128x128xf32>
    %c128_i32 = arith.constant 128 : i32
    %108 = vector.broadcast %c128_i32 : i32 to vector<128x128xi32>
    %109 = arith.select %107, %105, %108 : vector<128x128xi1>, vector<128x128xi32>
    %cst_45 = arith.constant dense<2147483647> : vector<128xi32>
    %110 = vector.multi_reduction <minsi>, %109, %cst_45 [1] : vector<128x128xi32> to vector<128xi32>
    %c127_i32 = arith.constant 127 : i32
    %111 = vector.broadcast %c127_i32 : i32 to vector<128xi32>
    %112 = arith.minsi %110, %111 : vector<128xi32>
    %113 = vector.shape_cast %112 : vector<128xi32> to vector<1x128xi32>
    %c0_46 = arith.constant 0 : index
    %c0_47 = arith.constant 0 : index
    %114 = vector.load %arg8[%c0_46, %c0_47] : memref<1x128xi32, #tpu.memory_space<vmem>>, vector<1x128xi32>
    tpu.vector_store %arg8[%c0_46, %c0_47], %113 {strides = array<i32>} : memref<1x128xi32, #tpu.memory_space<vmem>>, vector<1x128xi32>,
    return
  }
  func.func @transform_0(%arg0: i32) -> (i32, i32) {
    %c0_i32 = arith.constant 0 : i32
    %c0_i32_0 = arith.constant 0 : i32
    return %arg0, %c0_i32 : i32, i32
  }
  func.func @transform_1(%arg0: i32) -> (i32, i32) {
    %c0_i32 = arith.constant 0 : i32
    %c0_i32_0 = arith.constant 0 : i32
    %c0_i32_1 = arith.constant 0 : i32
    return %c0_i32, %c0_i32_0 : i32, i32
  }
  func.func @transform_2(%arg0: i32) -> (i32, i32) {
    %c0_i32 = arith.constant 0 : i32
    %c0_i32_0 = arith.constant 0 : i32
    %c0_i32_1 = arith.constant 0 : i32
    return %c0_i32, %c0_i32_0 : i32, i32
  }
  func.func @transform_3(%arg0: i32) -> (i32, i32) {
    %c0_i32 = arith.constant 0 : i32
    %c0_i32_0 = arith.constant 0 : i32
    %c0_i32_1 = arith.constant 0 : i32
    return %c0_i32, %c0_i32_0 : i32, i32
  }
  func.func @transform_4(%arg0: i32) -> (i32, i32) {
    %c0_i32 = arith.constant 0 : i32
    %c0_i32_0 = arith.constant 0 : i32
    %c0_i32_1 = arith.constant 0 : i32
    return %c0_i32, %c0_i32_0 : i32, i32
  }
  func.func @transform_5(%arg0: i32) -> (i32, i32) {
    %c0_i32 = arith.constant 0 : i32
    %c0_i32_0 = arith.constant 0 : i32
    %c0_i32_1 = arith.constant 0 : i32
    return %c0_i32, %c0_i32_0 : i32, i32
  }
  func.func @transform_6(%arg0: i32) -> (i32, i32) {
    %c0_i32 = arith.constant 0 : i32
    %c0_i32_0 = arith.constant 0 : i32
    %c0_i32_1 = arith.constant 0 : i32
    return %c0_i32, %c0_i32_0 : i32, i32
  }
  func.func @transform_7(%arg0: i32) -> (i32, i32) {
    %c0_i32 = arith.constant 0 : i32
    %c0_i32_0 = arith.constant 0 : i32
    return %c0_i32, %arg0 : i32, i32
  }
}

</mosaic_0001>

<bundles_post_ra>
// kernel: speaker_encoder_tokenize.1
= control target key start
LH: loop header
LB: loop body
LE: loop exit
PB: predicated region body
PF: predicated region fallthrough
CT: control target
= control target key end

     0   :  { %vm501_vm0 = vcmask 261120   ;;  %v42_v12 = vlaneseq  ;;  %vm4979_vm1 = vcmask 1040384   ;;  %vm4982_vm10 = vcmask 1046528   ;;  %s4971_s1 = inlined_call_operand.vmem [shape: f32[96,64], index: 1, kind: input, shape index: {}]   ;;  %s4972_s0 = inlined_call_operand.vmem [shape: f32[128,32], index: 0, kind: input, shape index: {}]   ;;  %s4973_s3 = inlined_call_operand.vmem [shape: f32[192,64], index: 3, kind: input, shape index: {}]   ;;  %s4974_s2 = inlined_call_operand.vmem [shape: f32[1,64], index: 2, kind: input, shape index: {}]   ;;  %s4975_s5 = inlined_call_operand.vmem [shape: f32[64,128], index: 5, kind: input, shape index: {}]   ;;  %s4976_s4 = inlined_call_operand.vmem [shape: f32[1,64], index: 4, kind: input, shape index: {}]   ;;  %s4977_s6 = inlined_call_operand.vmem [shape: f32[1,128], index: 6, kind: input, shape index: {}]   ;;  %s4978_s7 = inlined_call_operand.vmem [shape: s32[1,128], index: 7, kind: output, shape index: {}]  }
   0x1   :  { %v497_v0 = vld [vmem:[%s4971_s1 + $0x20] sm:$0xff]  ;;  %v498_v1 = vld [vmem:[%s4971_s1 + $0x28] sm:$0xff]  ;;  %v499_v2 = vld [vmem:[%s4971_s1 + $0x30] sm:$0xff] }
   0x2   :  { %v3338_v3 = vpack.c.bf16 %v498_v1, %v497_v0  ;;  %v500_v4 = vld [vmem:[%s4971_s1 + $0x38] sm:$0xff]  ;;  %v3613_v5 = vld [vmem:[%s4972_s0] sm:$0xff]  ;;  %v494_v8 = vld [vmem:[%s4971_s1 + $0x8] sm:$0xff]  ;;  %v3647_v17 = vshrl.u32 %v42_v12, 7 }
   0x3   :  { %v3342_v6 = vpack.c.bf16 %v500_v4, %v499_v2  ;;  %3090 = vmatprep.mubr.msk.f32.mxu0 %vm501_vm0, %v3613_v5  ;;  %v493_v7 = vld [vmem:[%s4971_s1] sm:$0xff]  ;;  %v495_v10 = vld [vmem:[%s4971_s1 + $0x10] sm:$0xff]  ;;  %v496_v11 = vld [vmem:[%s4971_s1 + $0x18] sm:$0xff]  ;;  %v300_v25 = vrot.slane %v3613_v5, 7 }
   0x4   :  { %3339 = vmatprep.subr.bf16.mxu0 %v3338_v3  ;;  %3426 = vmatprep.subr.bf16.mxu1 %v3338_v3  ;;  %v3346_v9 = vpack.c.bf16 %v494_v8, %v493_v7  ;;  %v3632_v13 = vld [vmem:[%s4972_s0 + $0x40] sm:$0xff]  ;;  %v3639_v14 = vld [vmem:[%s4972_s0 + $0x8] sm:$0xff]  ;;  %v3644_v15 = vld [vmem:[%s4972_s0 + $0x10] sm:$0xff]  ;;  %v3350_v16 = vpack.c.bf16 %v496_v11, %v495_v10  ;;  %v63_v26 = vand.u32 15, %v3647_v17  ;;  %v45_v27 = vadd.s32 16, %v3647_v17 }
   0x5   :  { %3341 = vmatpush3.bf16.msra.mxu0 %v3338_v3  ;;  %3428 = vmatpush3.bf16.msra.mxu1 %v3338_v3  ;;  %v872_v18 = vld [vmem:[%s4971_s1 + $0x40] sm:$0xff]  ;;  %v873_v19 = vld [vmem:[%s4971_s1 + $0x48] sm:$0xff]  ;;  %v3669_v21 = vld [vmem:[%s4972_s0 + $0x18] sm:$0xff]  ;;  %v303_v31 = vrot.slane %v3644_v15, 7  ;;  %v347_v34 = vsel %vm4979_vm1, 0.0, %v300_v25  ;;  %v47_v36 = vadd.s32 32, %v3647_v17 }
   0x6   :  { %3343 = vmatprep.subr.bf16.mxu0 %v3342_v6  ;;  %3427 = vmatprep.subr.bf16.mxu1 %v3342_v6  ;;  %v3658_v20 = vld [vmem:[%s4972_s0 + $0x48] sm:$0xff]  ;;  %v3674_v22 = vld [vmem:[%s4972_s0 + $0x50] sm:$0xff]  ;;  %v3679_v23 = vld [vmem:[%s4972_s0 + $0x20] sm:$0xff]  ;;  %v3354_v24 = vpack.c.bf16 %v873_v19, %v872_v18  ;;  %vm3715_vm2 = vcmp.eq.s32.totalorder %v63_v26, 0  ;;  %v77_v35 = vand.u32 15, %v45_v27  ;;  %v301_v39 = vrot.slane %v3639_v14, 7 }
   0x7   :  { %3102 = vmatprep.mubr.msk.f32.mxu1 %vm501_vm0, %v3632_v13  ;;  %v3689_v28 = vld [vmem:[%s4972_s0 + $0x58] sm:$0xff]  ;;  %v3700_v29 = vld [vmem:[%s4972_s0 + $0x28] sm:$0xff]  ;;  %v3705_v30 = vld [vmem:[%s4972_s0 + $0x60] sm:$0xff]  ;;  %v307_v41 = vrot.slane %v3679_v23, 7  ;;  %v380_v42 = vsel %vm3715_vm2, 0.0, %v347_v34  ;;  %v91_v45 = vand.u32 15, %v47_v36 }
   0x8   :  { %v3711_v32 = vld [vmem:[%s4972_s0 + $0x30] sm:$0xff]  ;;  %v3724_v37 = vld [vmem:[%s4972_s0 + $0x68] sm:$0xff]  ;;  %v3741_v40 = vld [vmem:[%s4972_s0 + $0x38] sm:$0xff]  ;;  %vm3748_vm3 = vcmp.eq.s32.totalorder %v77_v35, 0  ;;  %v304_v44 = vsel %vm4979_vm1, %v301_v39, %v303_v31  ;;  %v49_v46 = vadd.s32 48, %v3647_v17  ;;  %v305_v50 = vrot.slane %v3669_v21, 7 }
   0x9   :  { %3345 = vmatpush3.bf16.msra.mxu0 %v3342_v6  ;;  %3429 = vmatpush3.bf16.msra.mxu1 %v3342_v6  ;;  %v3731_v38 = vld [vmem:[%s4972_s0 + $0x70] sm:$0xff]  ;;  %v875_v48 = vld [vmem:[%s4971_s1 + $0x58] sm:$0xff]  ;;  %v302_v51 = vsel %vm4979_vm1, %v300_v25, %v301_v39  ;;  %v311_v52 = vrot.slane %v3711_v32, 7  ;;  %v382_v53 = vsel %vm3748_vm3, 0.0, %v304_v44  ;;  %vm3775_vm4 = vcmp.eq.s32.totalorder %v91_v45, 0  ;;  %v1787_v33 = vld [vmem:[%s4973_s3 + $0xa0] sm:$0xff] }
   0xa   :  { %3347 = vmatprep.subr.bf16.mxu0 %v3346_v9  ;;  %v874_v47 = vld [vmem:[%s4971_s1 + $0x50] sm:$0xff]  ;;  %v3763_v49 = vld [vmem:[%s4972_s0 + $0x78] sm:$0xff]  ;;  %v308_v56 = vsel %vm4979_vm1, %v305_v50, %v307_v41  ;;  %v105_v57 = vand.u32 15, %v49_v46  ;;  %v51_v58 = vadd.s32 64, %v3647_v17  ;;  %v309_v59 = vrot.slane %v3700_v29, 7 }
   0xb   :  { %v3358_v54 = vpack.c.bf16 %v875_v48, %v874_v47  ;;  %v306_v60 = vsel %vm4979_vm1, %v303_v31, %v305_v50  ;;  %v384_v61 = vsel %vm3775_vm4, 0.0, %v308_v56  ;;  %v315_v62 = vrot.slane %v3632_v13, 7 }
   0xc   :  { %3091 = vmatmul.mubr.msk.f32.vlgmr.msra.gmra.mrb[0].mxu0 %vm501_vm0, %v3639_v14  ;;  %3103 = vmatmul.mubr.msk.f32.vlgmr.msra.gmra.mrb[0].mxu1 %vm501_vm0, %v3658_v20  ;;  %vm3788_vm5 = vcmp.eq.s32.totalorder %v105_v57, 0  ;;  %v312_v0 = vsel %vm4979_vm1, %v309_v59, %v311_v52  ;;  %v119_v1 = vand.u32 15, %v51_v58  ;;  %v53_v2 = vadd.s32 80, %v3647_v17 }
   0xd   :  { %3349 = vmatpush3.bf16.msra.mxu0 %v3346_v9  ;;  %3093 = vmatprep.mubr.msk.f32.mxu0 %vm501_vm0, %v3644_v15  ;;  %v313_v3 = vrot.slane %v3741_v40, 7  ;;  %v310_v4 = vsel %vm4979_vm1, %v307_v41, %v309_v59  ;;  %v386_v6 = vsel %vm3788_vm5, 0.0, %v312_v0  ;;  %v319_v10 = vrot.slane %v3674_v22, 7 }
   0xe   :  { %3351 = vmatprep.subr.bf16.mxu0 %v3350_v16  ;;  %3105 = vmatprep.mubr.msk.f32.mxu1 %vm501_vm0, %v3674_v22  ;;  %vm3801_vm6 = vcmp.eq.s32.totalorder %v119_v1, 0  ;;  %v133_v9 = vand.u32 15, %v53_v2  ;;  %v55_v11 = vadd.s32 96, %v3647_v17  ;;  %v317_v18 = vrot.slane %v3658_v20, 7 }
   0xf   :  { %v316_v7 = vsel %vm4979_vm1, %v313_v3, %v315_v62  ;;  %v57_v31 = vadd.s32 112, %v3647_v17  ;;  %v321_v35 = vrot.slane %v3689_v28, 7  ;;  %v327_v44 = vrot.slane %v3731_v38, 7 }
  0x10   :  { %3094 = vmatmul.mubr.msk.f32.gmra.mrb[2].mxu0 %vm501_vm0, %v3669_v21  ;;  %3106 = vmatmul.mubr.msk.f32.gmra.mrb[2].mxu1 %vm501_vm0, %v3689_v28  ;;  %v388_v19 = vsel %vm3801_vm6, 0.0, %v316_v7  ;;  %vm3814_vm7 = vcmp.eq.s32.totalorder %v133_v9, 0  ;;  %v320_v26 = vsel %vm4979_vm1, %v317_v18, %v319_v10  ;;  %v147_v27 = vand.u32 15, %v55_v11 }
  0x11   :  { %3096 = vmatprep.mubr.msk.f32.mxu0 %vm501_vm0, %v3679_v23  ;;  %3353 = vmatpush3.bf16.msra.mxu0 %v3350_v16  ;;  %v314_v16 = vsel %vm4979_vm1, %v311_v52, %v313_v3  ;;  %v318_v34 = vsel %vm4979_vm1, %v315_v62, %v317_v18  ;;  %v390_v36 = vsel %vm3814_vm7, 0.0, %v320_v26  ;;  %v322_v45 = vsel %vm4979_vm1, %v319_v10, %v321_v35 }
  0x12   :  { %3355 = vmatprep.subr.bf16.mxu0 %v3354_v24  ;;  %3108 = vmatprep.mubr.msk.f32.mxu1 %vm501_vm0, %v3705_v30  ;;  %vm3826_vm8 = vcmp.eq.s32.totalorder %v147_v27, 0  ;;  %v325_v46 = vrot.slane %v3724_v37, 7  ;;  %v44_v48 = vadd.s32 8, %v3647_v17  ;;  %v397_v52 = vrot.slane %v3613_v5, 1 }
  0x13   :  { %v329_v56 = vrot.slane %v3763_v49, 7  ;;  %v400_v57 = vrot.slane %v3644_v15, 1  ;;  %v402_v5 = vrot.slane %v3669_v21, 1  ;;  %v48_v2 = vadd.s32 40, %v3647_v17 }
  0x14   :  { %3097 = vmatmul.mubr.msk.f32.gmra.mrb[4].mxu0 %vm501_vm0, %v3700_v29  ;;  %3109 = vmatmul.mubr.msk.f32.gmra.mrb[4].mxu1 %vm501_vm0, %v3724_v37  ;;  %v70_v59 = vand.u32 15, %v44_v48  ;;  %v406_v21 = vrot.slane %v3700_v29, 1  ;;  %v50_v10 = vadd.s32 56, %v3647_v17  ;;  %v410_v29 = vrot.slane %v3741_v40, 1 }
  0x15   :  { %3099 = vmatprep.mubr.msk.f32.mxu0 %vm501_vm0, %v3711_v32  ;;  %3111 = vmatprep.mubr.msk.f32.mxu1 %vm501_vm0, %v3731_v38  ;;  %v98_v9 = vand.u32 15, %v48_v2  ;;  %v5008_v18 = vmov 0  ;;  %v52_v26 = vadd.s32 72, %v3647_v17  ;;  %v56_v48 = vadd.s32 104, %v3647_v17  ;;  %v1405_v2 = vld [vmem:[%s4973_s3 + $0x48] sm:$0xff] }
  0x16   :  { %vm3860_vm11 = vcmp.eq.s32.totalorder %v70_v59, 15  ;;  %v426_v59 = vrot.slane %v3763_v49, 1 }
  0x17   :  { %vm3886_vm13 = vcmp.eq.s32.totalorder %v98_v9, 15  ;;  %v1409_v9 = vld [vmem:[%s4973_s3 + $0x68] sm:$0xff] }
  0x18   :  { %3100 = vmatmul.mubr.msk.f32.gmra.mrb[6].mxu0 %vm501_vm0, %v3741_v40  ;;  %3112 = vmatmul.mubr.msk.f32.gmra.mrb[6].mxu1 %vm501_vm0, %v3763_v49  ;;  %v5009_v18 = vsel %vm3886_vm13, 4294967295, %v5008_v18  ;;  %v5018_v49 = vmov 0 }
  0x19   :  { %3122 = vmatprep.mubr.msk.f32.mxu0 %vm501_vm0, %v380_v42  ;;  %v161_v42 = vand.u32 15, %v57_v31  ;;  %v414_v31 = vrot.slane %v3658_v20, 1  ;;  %v418_v20 = vrot.slane %v3689_v28, 1 }
  0x1b   :  { %vm3839_vm9 = vcmp.eq.s32.totalorder %v161_v42, 0 }
  0x1c   :  { %3123 = vmatmul.mubr.msk.f32.vlgmr.msra.gmra.mrb[0].mxu0 %vm501_vm0, %v302_v51  ;;  %v328_v51 = vsel %vm4979_vm1, %v325_v46, %v327_v44 }
  0x1d   :  { %3357 = vmatpush3.bf16.msra.mxu0 %v3354_v24  ;;  %3125 = vmatprep.mubr.msk.f32.mxu0 %vm501_vm0, %v382_v53  ;;  %v323_v24 = vrot.slane %v3705_v30, 7  ;;  %v398_v53 = vrot.slane %v3639_v14, 1  ;;  %v394_v58 = vsel %vm3839_vm9, 0.0, %v328_v51  ;;  %v404_v14 = vrot.slane %v3679_v23, 1 }
  0x1e   :  { %3359 = vmatprep.subr.bf16.mxu0 %v3358_v54  ;;  %v408_v23 = vrot.slane %v3711_v32, 1 }
  0x1f   :  { %v324_v41 = vsel %vm4979_vm1, %v321_v35, %v323_v24  ;;  %v399_v62 = vsel %vm4982_vm10, %v397_v52, %v398_v53  ;;  %v401_v0 = vsel %vm4982_vm10, %v398_v53, %v400_v57  ;;  %v405_v7 = vsel %vm4982_vm10, %v402_v5, %v404_v14 }
  0x20   :  { %3126 = vmatmul.mubr.msk.f32.gmra.mrb[2].mxu0 %vm501_vm0, %v306_v60  ;;  %v392_v47 = vsel %vm3826_vm8, 0.0, %v324_v41  ;;  %v46_v60 = vadd.s32 24, %v3647_v17  ;;  %v478_v3 = vsel %vm3860_vm11, 0.0, %v401_v0  ;;  %v407_v11 = vsel %vm4982_vm10, %v404_v14, %v406_v21 }
  0x21   :  { %3128 = vmatprep.mubr.msk.f32.mxu0 %vm501_vm0, %v384_v61  ;;  %3361 = vmatpush3.bf16.msra.mxu0 %v3358_v54  ;;  %v326_v54 = vsel %vm4979_vm1, %v323_v24, %v325_v46  ;;  %v330_v61 = vsel %vm4979_vm1, %v327_v44, %v329_v56  ;;  %v112_v24 = vand.u32 15, %v50_v10  ;;  %v411_v27 = vsel %vm4982_vm10, %v408_v23, %v410_v29 }
  0x22   :  { %v84_v1 = vand.u32 15, %v46_v60  ;;  %v126_v35 = vand.u32 15, %v52_v26  ;;  %v54_v41 = vadd.s32 88, %v3647_v17  ;;  %v5012_v46 = vmov 0 }
  0x23   :  { %vm3899_vm14 = vcmp.eq.s32.totalorder %v112_v24, 15  ;;  %v422_v52 = vrot.slane %v3724_v37, 1  ;;  %v5014_v53 = vmov 0  ;;  %v424_v56 = vrot.slane %v3731_v38, 1 }
  0x24   :  { %3129 = vmatmul.mubr.msk.f32.gmra.mrb[4].mxu0 %vm501_vm0, %v310_v4  ;;  %v403_v4 = vsel %vm4982_vm10, %v400_v57, %v402_v5  ;;  %vm3873_vm12 = vcmp.eq.s32.totalorder %v84_v1, 15  ;;  %vm3912_vm15 = vcmp.eq.s32.totalorder %v126_v35, 15  ;;  %v58_v57 = vadd.s32 120, %v3647_v17  ;;  %v1404_v1 = vld [vmem:[%s4973_s3 + $0x40] sm:$0xff] }
  0x25   :  { %3131 = vmatprep.mubr.msk.f32.mxu0 %vm501_vm0, %v386_v6  ;;  %v480_v32 = vsel %vm3873_vm12, 0.0, %v405_v7  ;;  %v5013_v46 = vsel %vm3912_vm15, 4294967295, %v5012_v46  ;;  %v5016_v60 = vmov 0  ;;  %v425_v5 = vsel %vm4982_vm10, %v422_v52, %v424_v56  ;;  %v1408_v7 = vld [vmem:[%s4973_s3 + $0x60] sm:$0xff] }
  0x26   :  { %v168_v38 = vand.u32 15, %v58_v57  ;;  %v3370_v10 = vpack.c.bf16 %v1409_v9, %v1408_v7 }
  0x28   :  { %3132 = vmatmul.mubr.msk.f32.gmra.mrb[6].mxu0 %vm501_vm0, %v314_v16  ;;  %v412_v16 = vrot.slane %v3632_v13, 1 }
  0x29   :  { %3134 = vmatprep.mubr.msk.f32.mxu0 %vm501_vm0, %v388_v19  ;;  %v409_v19 = vsel %vm4982_vm10, %v406_v21, %v408_v23  ;;  %v3362_v21 = vpack.c.bf16 %v1405_v2, %v1404_v1  ;;  %v1406_v23 = vld [vmem:[%s4973_s3 + $0x50] sm:$0xff] }
  0x2a   :  { %v482_v40 = vsel %vm3886_vm13, 0.0, %v409_v19  ;;  %v413_v13 = vsel %vm4982_vm10, %v410_v29, %v412_v16  ;;  %v415_v44 = vsel %vm4982_vm10, %v412_v16, %v414_v31  ;;  %v1410_v29 = vld [vmem:[%s4973_s3 + $0x70] sm:$0xff]  ;;  %v1396_v16 = vld [vmem:[%s4973_s3] sm:$0xff]  ;;  %v1397_v19 = vld [vmem:[%s4973_s3 + $0x8] sm:$0xff] }
  0x2b   :  { %v484_v42 = vsel %vm3899_vm14, 0.0, %v413_v13  ;;  %3363 = vmatprep.subr.bf16.mxu1 %v3362_v21  ;;  %v3987_v24 = vpack.c.bf16 %v1397_v19, %v1396_v16 }
  0x2c   :  { %3135 = vmatmul.mubr.msk.f32.gmra.mrb[8].mxu0 %vm501_vm0, %v318_v34  ;;  %v5010_v34 = vmov 0  ;;  %3365 = vmatpush3.bf16.msra.mxu1 %v3362_v21 }
  0x2d   :  { %3137 = vmatprep.mubr.msk.f32.mxu0 %vm501_vm0, %v390_v36  ;;  %v5011_v34 = vsel %vm3899_vm14, 4294967295, %v5010_v34  ;;  %v416_v36 = vrot.slane %v3674_v22, 1 }
  0x2f   :  { %v417_v22 = vsel %vm4982_vm10, %v414_v31, %v416_v36  ;;  %v419_v28 = vsel %vm4982_vm10, %v416_v36, %v418_v20 }
  0x30   :  { %3138 = vmatmul.mubr.msk.f32.gmra.mrb[10].mxu0 %vm501_vm0, %v322_v45  ;;  %v420_v45 = vrot.slane %v3705_v30, 1  ;;  %v486_v51 = vsel %vm3912_vm15, 0.0, %v417_v22 }
  0x31   :  { %3140 = vmatprep.mubr.msk.f32.mxu0 %vm501_vm0, %v392_v47  ;;  %v140_v47 = vand.u32 15, %v54_v41 }
  0x32   :  { %v421_v30 = vsel %vm4982_vm10, %v418_v20, %v420_v45  ;;  %v423_v37 = vsel %vm4982_vm10, %v420_v45, %v422_v52 }
  0x33   :  { %vm3925_vm1 = vcmp.eq.s32.totalorder %v140_v47, 15 }
  0x34   :  { %3141 = vmatmul.mubr.msk.f32.gmra.mrb[12].mxu0 %vm501_vm0, %v326_v54  ;;  %v5015_v53 = vsel %vm3925_vm1, 4294967295, %v5014_v53  ;;  %v154_v54 = vand.u32 15, %v56_v48 }
  0x35   :  { %3143 = vmatprep.mubr.msk.f32.mxu0 %vm501_vm0, %v394_v58  ;;  %v488_v58 = vsel %vm3925_vm1, 0.0, %v421_v30  ;;  %vm3947_vm1 = vcmp.eq.s32.totalorder %v168_v38, 15 }
  0x36   :  { %vm3937_vm15 = vcmp.eq.s32.totalorder %v154_v54, 15  ;;  %v5019_v49 = vsel %vm3947_vm1, 4294967295, %v5018_v49 }
  0x37   :  { %v5017_v60 = vsel %vm3937_vm15, 4294967295, %v5016_v60  ;;  %v490_v14 = vsel %vm3937_vm15, 0.0, %v425_v5 }
  0x38   :  { %3144 = vmatmul.mubr.msk.f32.gmra.mrb[14].mxu0 %vm501_vm0, %v330_v61  ;;  %v427_v61 = vsel %vm4982_vm10, %v424_v56, %v426_v59 }
  0x39   :  { %3154 = vmatprep.mubr.msk.f32.mxu0 %vm501_vm0, %v399_v62  ;;  %v444_v62 = vsel %vm4982_vm10, %v426_v59, 0.0  ;;  %vm5020_vm10 = vcmask 1040384  }
  0x3a   :  { %v492_v0 = vsel %vm3947_vm1, 0.0, %v444_v62  ;;  %vm5022_vm1 = vcmask 523264  }
  0x3c   :  { %3155 = vmatmul.mubr.msk.f32.vlgmr.msra.gmra.mrb[0].mxu0 %vm501_vm0, %v478_v3  ;;  %v1407_v3 = vld [vmem:[%s4973_s3 + $0x58] sm:$0xff] }
  0x3d   :  { %3157 = vmatprep.mubr.msk.f32.mxu0 %vm501_vm0, %v403_v4  ;;  %v3366_v4 = vpack.c.bf16 %v1407_v3, %v1406_v23 }
  0x3f   :  { %3367 = vmatprep.subr.bf16.mxu1 %v3366_v4 }
  0x40   :  { %3158 = vmatmul.mubr.msk.f32.gmra.mrb[2].mxu0 %vm501_vm0, %v480_v32  ;;  %3369 = vmatpush3.bf16.msra.mxu1 %v3366_v4  ;;  %v1411_v32 = vld [vmem:[%s4973_s3 + $0x78] sm:$0xff] }
  0x41   :  { %3160 = vmatprep.mubr.msk.f32.mxu0 %vm501_vm0, %v407_v11  ;;  %3371 = vmatprep.subr.bf16.mxu1 %v3370_v10  ;;  %v3374_v11 = vpack.c.bf16 %v1411_v32, %v1410_v29 }
  0x44   :  { %3161 = vmatmul.mubr.msk.f32.gmra.mrb[4].mxu0 %vm501_vm0, %v482_v40  ;;  %3373 = vmatpush3.bf16.msra.mxu1 %v3370_v10 }
  0x45   :  { %3163 = vmatprep.mubr.msk.f32.mxu0 %vm501_vm0, %v411_v27  ;;  %3375 = vmatprep.subr.bf16.mxu1 %v3374_v11 }
  0x48   :  { %3164 = vmatmul.mubr.msk.f32.gmra.mrb[6].mxu0 %vm501_vm0, %v484_v42  ;;  %3377 = vmatpush3.bf16.msra.mxu1 %v3374_v11  ;;  %v4009_v42 = vld [vmem:[%s4974_s2] ss:$0 sm:$0xff] }
  0x49   :  { %3166 = vmatprep.mubr.msk.f32.mxu0 %vm501_vm0, %v415_v44  ;;  %3379 = vmatprep.subr.bf16.mxu1 %v3987_v24 }
  0x4c   :  { %3167 = vmatmul.mubr.msk.f32.gmra.mrb[8].mxu0 %vm501_vm0, %v486_v51 }
  0x4d   :  { %3169 = vmatprep.mubr.msk.f32.mxu0 %vm501_vm0, %v419_v28 }
  0x50   :  { %3170 = vmatmul.mubr.msk.f32.gmra.mrb[10].mxu0 %vm501_vm0, %v488_v58 }
  0x51   :  { %3172 = vmatprep.mubr.msk.f32.mxu0 %vm501_vm0, %v423_v37 }
  0x54   :  { %3173 = vmatmul.mubr.msk.f32.gmra.mrb[12].mxu0 %vm501_vm0, %v490_v14 }
  0x55   :  { %3175 = vmatprep.mubr.msk.f32.mxu0 %vm501_vm0, %v427_v61 }
  0x58   :  { %3176 = vmatmul.mubr.msk.f32.gmra.mrb[14].mxu0 %vm501_vm0, %v492_v0  ;;  %vm4983_vm0 = vcmask 523264  }
  0xdf   :  { %v3990_v26 = vpop.f32.mrb[0].mxu1 }
  0xe0   :  { %v3992_v40 = vpop.f32.mrb[1].mxu1 }
  0xe3   :  { %v3994_v27 = vpop.f32.mrb[2].mxu1 }
  0xe4   :  { %v3996_v13 = vpop.f32.mrb[3].mxu1 }
  0xe7   :  { %v3998_v31 = vpop.f32.mrb[4].mxu1 }
  0xe8   :  { %v4000_v35 = vpop.f32.mrb[5].mxu1 }
  0xeb   :  { %v4002_v36 = vpop.f32.mrb[6].mxu1 }
  0xec   :  { %v4004_v41 = vpop.f32.mrb[7].mxu1 }
 0x10f   :  { %v3156_v44 = vpop.f32.mrb[0].mxu0 }
 0x110   :  { %v4012_v20 = vadd.f32 %v3156_v44, %v4009_v42  ;;  %v990_v45 = vpop.f32.mrb[1].mxu0 }
 0x111   :  { %v4015_v22 = vadd.f32 %v4009_v42, %v990_v45 }
 0x112   :  { %v1109_v47 = vmul.f32 %v4012_v20, %v4012_v20 }
 0x113   :  { %v1108_v48 = vmul.f32 %v4015_v22, %v4015_v22  ;;  %v3159_v51 = vpop.f32.mrb[2].mxu0 }
 0x114   :  { %v1125_v28 = vmul.f32 %v1109_v47, %v4012_v20  ;;  %v4023_v30 = vadd.f32 %v3159_v51, %v4009_v42  ;;  %v1000_v52 = vpop.f32.mrb[3].mxu0  ;;  %v1398_v51 = vld [vmem:[%s4973_s3 + $0x10] sm:$0xff] }
 0x115   :  { %v1124_v54 = vmul.f32 %v1108_v48, %v4015_v22  ;;  %v4027_v56 = vadd.f32 %v4009_v42, %v1000_v52  ;;  %v1400_v52 = vld [vmem:[%s4973_s3 + $0x20] sm:$0xff] }
 0x116   :  { %v1141_v57 = vmul.f32 0.044715, %v1125_v28  ;;  %v1111_v58 = vmul.f32 %v4023_v30, %v4023_v30  ;;  %v1399_v28 = vld [vmem:[%s4973_s3 + $0x18] sm:$0xff] }
 0x117   :  { %v1140_v59 = vmul.f32 0.044715, %v1124_v54  ;;  %v1110_v37 = vmul.f32 %v4027_v56, %v4027_v56  ;;  %v3162_v5 = vpop.f32.mrb[4].mxu0 }
 0x118   :  { %v1157_v38 = vadd.f32 %v1141_v57, %v4012_v20  ;;  %v1127_v14 = vmul.f32 %v1111_v58, %v4023_v30  ;;  %v4036_v61 = vadd.f32 %v3162_v5, %v4009_v42  ;;  %v1010_v62 = vpop.f32.mrb[5].mxu0 }
 0x119   :  { %v1156_v0 = vadd.f32 %v1140_v59, %v4015_v22  ;;  %v1126_v1 = vmul.f32 %v1110_v37, %v4027_v56  ;;  %v4041_v2 = vadd.f32 %v4009_v42, %v1010_v62  ;;  %v1401_v37 = vld [vmem:[%s4973_s3 + $0x28] sm:$0xff] }
 0x11a   :  { %v1173_v21 = vmul.f32 0.7978846, %v1157_v38  ;;  %v1143_v23 = vmul.f32 0.044715, %v1127_v14  ;;  %v1113_v3 = vmul.f32 %v4036_v61, %v4036_v61 }
 0x11b   :  { %v1172_v4 = vmul.f32 0.7978846, %v1156_v0  ;;  %v1142_v7 = vmul.f32 0.044715, %v1126_v1  ;;  %v1112_v9 = vmul.f32 %v4041_v2, %v4041_v2  ;;  %v3165_v10 = vpop.f32.mrb[6].mxu0 }
 0x11c   :  { %3494 = vtanh.f32 %v1173_v21  ;;  %v1159_v29 = vadd.f32 %v1143_v23, %v4023_v30  ;;  %v1129_v32 = vmul.f32 %v1113_v3, %v4036_v61  ;;  %v4050_v11 = vadd.f32 %v3165_v10, %v4009_v42  ;;  %v1020_v16 = vpop.f32.mrb[7].mxu0 }
 0x11d   :  { %v1158_v19 = vadd.f32 %v1142_v7, %v4027_v56  ;;  %v1128_v44 = vmul.f32 %v1112_v9, %v4041_v2  ;;  %v4055_v45 = vadd.f32 %v4009_v42, %v1020_v16  ;;  %3496 = vtanh.f32 %v1172_v4 }
 0x11e   :  { %v1145_v47 = vmul.f32 0.044715, %v1129_v32  ;;  %v1115_v48 = vmul.f32 %v4050_v11, %v4050_v11  ;;  %v1175_v54 = vmul.f32 0.7978846, %v1159_v29  ;;  %v4079_v3 = vpack.c.bf16 %v1399_v28, %v1398_v51 }
 0x11f   :  { %v1144_v57 = vmul.f32 0.044715, %v1128_v44  ;;  %v1114_v58 = vmul.f32 %v4055_v45, %v4055_v45  ;;  %v3168_v59 = vpop.f32.mrb[8].mxu0  ;;  %v1174_v5 = vmul.f32 0.7978846, %v1158_v19  ;;  %v4084_v10 = vpack.c.bf16 %v1401_v37, %v1400_v52 }
 0x120   :  { %v1161_v38 = vadd.f32 %v1145_v47, %v4036_v61  ;;  %v1131_v14 = vmul.f32 %v1115_v48, %v4050_v11  ;;  %v3430_v62 = vadd.f32 %v3168_v59, %v3990_v26  ;;  %v1030_v0 = vpop.f32.mrb[9].mxu0  ;;  %3498 = vtanh.f32 %v1175_v54 }
 0x121   :  { %v1160_v1 = vadd.f32 %v1144_v57, %v4041_v2  ;;  %v1130_v21 = vmul.f32 %v1114_v58, %v4055_v45  ;;  %v3431_v23 = vadd.f32 %v1030_v0, %v3992_v40  ;;  %3500 = vtanh.f32 %v1174_v5 }
 0x122   :  { %v1177_v4 = vmul.f32 0.7978846, %v1161_v38  ;;  %v1147_v7 = vmul.f32 0.044715, %v1131_v14  ;;  %v4082_v9 = vadd.f32 %v3430_v62, %v4009_v42 }
 0x123   :  { %v1176_v29 = vmul.f32 0.7978846, %v1160_v1  ;;  %v1146_v32 = vmul.f32 0.044715, %v1130_v21  ;;  %v4087_v26 = vadd.f32 %v3431_v23, %v4009_v42  ;;  %v3171_v16 = vpop.f32.mrb[10].mxu0 }
 0x124   :  { %v1163_v19 = vadd.f32 %v1147_v7, %v4050_v11  ;;  %v1117_v40 = vmul.f32 %v4082_v9, %v4082_v9  ;;  %v3432_v44 = vadd.f32 %v3171_v16, %v3994_v27  ;;  %v1040_v47 = vpop.f32.mrb[11].mxu0  ;;  %3502 = vtanh.f32 %v1177_v4 }
 0x125   :  { %v1162_v48 = vadd.f32 %v1146_v32, %v4055_v45  ;;  %v1116_v51 = vmul.f32 %v4087_v26, %v4087_v26  ;;  %v3433_v28 = vadd.f32 %v1040_v47, %v3996_v13  ;;  %3504 = vtanh.f32 %v1176_v29 }
 0x126   :  { %v3495_v52 = vpop.eup %3494  ;;  %v1179_v54 = vmul.f32 0.7978846, %v1163_v19  ;;  %v1133_v57 = vmul.f32 %v1117_v40, %v4082_v9  ;;  %v4099_v58 = vadd.f32 %v3432_v44, %v4009_v42 }
 0x127   :  { %v1205_v59 = vadd.f32 1.0, %v3495_v52  ;;  %v1178_v37 = vmul.f32 0.7978846, %v1162_v48  ;;  %v1132_v27 = vmul.f32 %v1116_v51, %v4087_v26  ;;  %v4103_v5 = vadd.f32 %v3433_v28, %v4009_v42  ;;  %v3174_v38 = vpop.f32.mrb[12].mxu0  ;;  %v3497_v14 = vpop.eup %3496 }
 0x128   :  { %3506 = vtanh.f32 %v1179_v54  ;;  %v1149_v62 = vmul.f32 0.044715, %v1133_v57  ;;  %v1119_v13 = vmul.f32 %v4099_v58, %v4099_v58  ;;  %v3434_v0 = vadd.f32 %v3174_v38, %v3998_v31  ;;  %v1050_v1 = vpop.f32.mrb[13].mxu0 }
 0x129   :  { %v1221_v21 = vmul.f32 0.5, %v1205_v59  ;;  %3508 = vtanh.f32 %v1178_v37  ;;  %v1148_v23 = vmul.f32 0.044715, %v1132_v27  ;;  %v1118_v4 = vmul.f32 %v4103_v5, %v4103_v5 }
 0x12a   :  { %v1165_v7 = vadd.f32 %v1149_v62, %v4082_v9  ;;  %v1135_v29 = vmul.f32 %v1119_v13, %v4099_v58  ;;  %v4113_v32 = vadd.f32 %v3434_v0, %v4009_v42  ;;  %v3435_v16 = vadd.f32 %v1050_v1, %v4000_v35  ;;  %v3499_v57 = vpop.eup %3498 }
 0x12b   :  { %v4117_v19 = vmul.f32 %v1221_v21, %v4012_v20  ;;  %v1164_v31 = vadd.f32 %v1148_v23, %v4087_v26  ;;  %v1134_v40 = vmul.f32 %v1118_v4, %v4103_v5  ;;  %v3177_v44 = vpop.f32.mrb[14].mxu0  ;;  %v1204_v47 = vadd.f32 1.0, %v3497_v14  ;;  %v3501_v27 = vpop.eup %3500 }
 0x12c   :  { %v1181_v48 = vmul.f32 0.7978846, %v1165_v7  ;;  %v1151_v51 = vmul.f32 0.044715, %v1135_v29  ;;  %v1121_v28 = vmul.f32 %v4113_v32, %v4113_v32  ;;  %v4124_v52 = vadd.f32 %v3435_v16, %v4009_v42  ;;  %v1060_v54 = vpop.f32.mrb[15].mxu0 }
 0x12d   :  { %v1180_v35 = vmul.f32 0.7978846, %v1164_v31  ;;  %v1150_v59 = vmul.f32 0.044715, %v1134_v40  ;;  %v3436_v20 = vadd.f32 %v3177_v44, %v4002_v36  ;;  %v3437_v37 = vadd.f32 %v1060_v54, %v4004_v41 }
 0x12e   :  { %3510 = vtanh.f32 %v1181_v48  ;;  %v1167_v38 = vadd.f32 %v1151_v51, %v4099_v58  ;;  %v1137_v14 = vmul.f32 %v1121_v28, %v4113_v32  ;;  %v1120_v62 = vmul.f32 %v4124_v52, %v4124_v52  ;;  %v3503_v13 = vpop.eup %3502 }
 0x12f   :  { %3512 = vtanh.f32 %v1180_v35  ;;  %v1166_v0 = vadd.f32 %v1150_v59, %v4103_v5  ;;  %v4134_v1 = vadd.f32 %v3436_v20, %v4009_v42  ;;  %v4137_v36 = vadd.f32 %v3437_v37, %v4009_v42  ;;  %v3505_v41 = vpop.eup %3504 }
 0x130   :  { %v1183_v21 = vmul.f32 0.7978846, %v1167_v38  ;;  %v1153_v23 = vmul.f32 0.044715, %v1137_v14  ;;  %v1136_v4 = vmul.f32 %v1120_v62, %v4124_v52  ;;  %v1220_v7 = vmul.f32 0.5, %v1204_v47  ;;  %v1403_v38 = vld [vmem:[%s4973_s3 + $0x38] sm:$0xff] }
 0x131   :  { %v1182_v29 = vmul.f32 0.7978846, %v1166_v0  ;;  %v1123_v16 = vmul.f32 %v4134_v1, %v4134_v1  ;;  %v1122_v31 = vmul.f32 %v4137_v36, %v4137_v36  ;;  %v1206_v40 = vadd.f32 1.0, %v3501_v27 }
 0x132   :  { %v3507_v44 = vpop.eup %3506  ;;  %3514 = vtanh.f32 %v1183_v21  ;;  %v1169_v48 = vadd.f32 %v1153_v23, %v4113_v32  ;;  %v1152_v42 = vmul.f32 0.044715, %v1136_v4  ;;  %v4146_v51 = vmul.f32 %v1220_v7, %v4015_v22  ;;  %v1402_v22 = vld [vmem:[%s4973_s3 + $0x30] sm:$0xff] }
 0x133   :  { %v3509_v28 = vpop.eup %3508  ;;  %3516 = vtanh.f32 %v1182_v29  ;;  %v1139_v47 = vmul.f32 %v1123_v16, %v4134_v1  ;;  %v1138_v54 = vmul.f32 %v1122_v31, %v4137_v36  ;;  %v1222_v35 = vmul.f32 0.5, %v1206_v40 }
 0x134   :  { %v1185_v59 = vmul.f32 0.7978846, %v1169_v48  ;;  %v1168_v20 = vadd.f32 %v1152_v42, %v4124_v52  ;;  %3194 = vmatprep.mubr.msk.f32.mxu1 %vm4983_vm0, %v4146_v51  ;;  %v1207_v37 = vadd.f32 1.0, %v3499_v57  ;;  %v1208_v27 = vadd.f32 1.0, %v3505_v41 }
 0x135   :  { %v1155_v14 = vmul.f32 0.044715, %v1139_v47  ;;  %v1154_v62 = vmul.f32 0.044715, %v1138_v54  ;;  %3195 = vmatmul.mubr.msk.f32.vlgmr.msra.gmra.mrb[8].mxu1 %vm4983_vm0, %v4117_v19  ;;  %v4162_v0 = vmul.f32 %v1222_v35, %v4027_v56  ;;  %v1209_v21 = vadd.f32 1.0, %v3503_v13 }
 0x136   :  { %3518 = vtanh.f32 %v1185_v59  ;;  %v1184_v57 = vmul.f32 0.7978846, %v1168_v20  ;;  %3381 = vmatpush3.bf16.msra.mxu1 %v3987_v24  ;;  %v1223_v41 = vmul.f32 0.5, %v1207_v37  ;;  %v1224_v23 = vmul.f32 0.5, %v1208_v27 }
 0x137   :  { %v1171_v4 = vadd.f32 %v1155_v14, %v4134_v1  ;;  %v1170_v7 = vadd.f32 %v1154_v62, %v4137_v36  ;;  %3197 = vmatprep.mubr.msk.f32.mxu1 %vm4983_vm0, %v4162_v0  ;;  %v1225_v29 = vmul.f32 0.5, %v1209_v21  ;;  %3383 = vmatprep.subr.bf16.mxu1 %v4079_v3  ;;  %v3390_v16 = vpack.c.bf16 %v1403_v38, %v1402_v22 }
 0x138   :  { %v3511_v56 = vpop.eup %3510  ;;  %3520 = vtanh.f32 %v1184_v57  ;;  %v4171_v13 = vmul.f32 %v1223_v41, %v4023_v30  ;;  %v4174_v24 = vmul.f32 %v1224_v23, %v4041_v2  ;;  %v1210_v31 = vadd.f32 1.0, %v3509_v28 }
 0x139   :  { %v3513_v40 = vpop.eup %3512  ;;  %v1187_v48 = vmul.f32 0.7978846, %v1171_v4  ;;  %v1186_v42 = vmul.f32 0.7978846, %v1170_v7  ;;  %v4177_v47 = vmul.f32 %v1225_v29, %v4036_v61  ;;  %v1211_v54 = vadd.f32 1.0, %v3507_v44  ;;  %v1783_v61 = vld [vmem:[%s4973_s3 + $0x80] sm:$0xff] }
 0x13a   :  { %3198 = vmatmul.mubr.msk.f32.gmra.mrb[10].mxu1 %vm4983_vm0, %v4171_v13  ;;  %v1226_v35 = vmul.f32 0.5, %v1210_v31  ;;  %v1212_v59 = vadd.f32 1.0, %v3513_v40  ;;  %v1213_v20 = vadd.f32 1.0, %v3511_v56  ;;  %v1268_v30 = vrot.slane %v4146_v51, 7  ;;  %v1784_v44 = vld [vmem:[%s4973_s3 + $0x88] sm:$0xff] }
 0x13b   :  { %3522 = vtanh.f32 %v1187_v48  ;;  %3200 = vmatprep.mubr.msk.f32.mxu1 %vm4983_vm0, %v4174_v24  ;;  %3385 = vmatpush3.bf16.msra.mxu1 %v4079_v3  ;;  %v1227_v2 = vmul.f32 0.5, %v1211_v54  ;;  %v1269_v28 = vrot.slane %v4117_v19, 7  ;;  %v1271_v37 = vrot.slane %v4162_v0, 7 }
 0x13c   :  { %v3515_v27 = vpop.eup %3514  ;;  %3524 = vtanh.f32 %v1186_v42  ;;  %v4194_v22 = vmul.f32 %v1226_v35, %v4055_v45  ;;  %v1228_v38 = vmul.f32 0.5, %v1212_v59  ;;  %v1229_v3 = vmul.f32 0.5, %v1213_v20  ;;  %3387 = vmatprep.subr.bf16.mxu1 %v4084_v10 }
 0x13d   :  { %v3517_v14 = vpop.eup %3516  ;;  %v1215_v62 = vadd.f32 1.0, %v3515_v27  ;;  %v4200_v21 = vsel %vm5020_vm10, %v1268_v30, %v1269_v28  ;;  %v4205_v57 = vmul.f32 %v1227_v2, %v4050_v11  ;;  %v4210_v23 = vpack.c.bf16 %v1784_v44, %v1783_v61 }
 0x13e   :  { %3201 = vmatmul.mubr.msk.f32.gmra.mrb[12].mxu1 %vm4983_vm0, %v4177_v47  ;;  %v4208_v45 = vmul.f32 %v1228_v38, %v4087_v26  ;;  %v1214_v41 = vadd.f32 1.0, %v3517_v14  ;;  %v4216_v7 = vsel %vm5020_vm10, %v1269_v28, %v1271_v37  ;;  %v1273_v29 = vrot.slane %v4171_v13, 7 }
 0x13f   :  { %3203 = vmatprep.mubr.msk.f32.mxu1 %vm4983_vm0, %v4194_v22  ;;  %3389 = vmatpush3.bf16.msra.mxu1 %v4084_v10  ;;  %v1231_v4 = vmul.f32 0.5, %v1215_v62  ;;  %v1275_v11 = vrot.slane %v4174_v24, 7  ;;  %v4221_v26 = vmul.f32 %v1229_v3, %v4082_v9  ;;  %v1277_v40 = vrot.slane %v4177_v47, 7  ;;  %vm5021_vm0 = vmmov %vm5020_vm10 }
 0x140   :  { %v3519_v56 = vpop.eup %3518  ;;  %v1230_v31 = vmul.f32 0.5, %v1214_v41  ;;  %3391 = vmatprep.subr.bf16.mxu1 %v3390_v16  ;;  %v1279_v48 = vrot.slane %v4194_v22, 7  ;;  %v4229_v54 = vsel %vm5020_vm10, %v1271_v37, %v1273_v29  ;;  %vm5023_vm15 = vmmov %vm5021_vm0  ;;  %v1335_v2 = vrot.slane %v4162_v0, 1 }
 0x141   :  { %v4226_v10 = vmul.f32 %v1231_v4, %v4099_v58  ;;  %v1217_v42 = vadd.f32 1.0, %v3519_v56  ;;  %v4232_v35 = vsel %vm5021_vm0, %v1273_v29, %v1275_v11  ;;  %v4240_v20 = vsel %vm5023_vm15, %v1275_v11, %v1277_v40  ;;  %vm5024_vm14 = vmmov %vm5021_vm0 }
 0x142   :  { %v3521_v59 = vpop.eup %3520  ;;  %3204 = vmatmul.mubr.msk.f32.gmra.mrb[14].mxu1 %vm5022_vm1, %v4205_v57  ;;  %v4237_v9 = vmul.f32 %v1230_v31, %v4103_v5  ;;  %v4243_v58 = vsel %vm5024_vm14, %v1277_v40, %v1279_v48  ;;  %vm5025_vm10 = vmmov %vm5022_vm1  ;;  %v1281_v44 = vrot.slane %v4205_v57, 7  ;;  %v1283_v5 = vrot.slane %v4208_v45, 7 }
 0x143   :  { %3206 = vmatprep.mubr.msk.f32.mxu1 %vm5025_vm10, %v4208_v45  ;;  %v1216_v28 = vadd.f32 1.0, %v3521_v59  ;;  %v1233_v61 = vmul.f32 0.5, %v1217_v42  ;;  %3393 = vmatpush3.bf16.msra.mxu1 %v3390_v16  ;;  %v1285_v37 = vrot.slane %v4221_v26, 7  ;;  %v1289_v38 = vrot.slane %v4226_v10, 7  ;;  %vm5026_vm1 = vmmov %vm5021_vm0 }
 0x144   :  { %3395 = vmatprep.subr.bf16.mxu1 %v4210_v23  ;;  %v1287_v27 = vrot.slane %v4237_v9, 7  ;;  %v4258_v62 = vsel %vm5026_vm1, %v1279_v48, %v1281_v44  ;;  %v1332_v16 = vrot.slane %v4146_v51, 1  ;;  %vm5027_vm14 = vmmov %vm5025_vm10  ;;  %v1333_v59 = vrot.slane %v4117_v19, 1 }
 0x145   :  { %v3523_v3 = vpop.eup %3522  ;;  %v1232_v0 = vmul.f32 0.5, %v1216_v28  ;;  %v4255_v14 = vmul.f32 %v1233_v61, %v4113_v32  ;;  %vm5028_vm15 = vmmov %vm5021_vm0  ;;  %v4267_v11 = vsel %vm5021_vm0, %v1283_v5, %v1285_v37  ;;  %v1341_v19 = vrot.slane %v4177_v47, 1 }
 0x146   :  { %v3525_v41 = vpop.eup %3524  ;;  %3207 = vmatmul.mubr.msk.f32.gmra.mrb[16].mxu1 %vm5027_vm14, %v4221_v26  ;;  %v1219_v4 = vadd.f32 1.0, %v3523_v3  ;;  %v4264_v29 = vsel %vm5028_vm15, %v1281_v44, %v1283_v5  ;;  %vm5029_vm10 = vmmov %vm5021_vm0  ;;  %v1337_v44 = vrot.slane %v4171_v13, 1  ;;  %v1339_v5 = vrot.slane %v4174_v24, 1 }
 0x147   :  { %v4270_v56 = vsel %vm5029_vm10, %v1285_v37, %v1287_v27  ;;  %vm5030_vm13 = vmmov %vm5027_vm14  ;;  %v1248_v32 = vmul.f32 %v1232_v0, %v4124_v52  ;;  %v1218_v31 = vadd.f32 1.0, %v3525_v41  ;;  %v1293_v42 = vrot.slane %v4255_v14, 7 }
 0x148   :  { %3209 = vmatprep.mubr.msk.f32.mxu1 %vm5030_vm13, %v4237_v9  ;;  %v1235_v40 = vmul.f32 0.5, %v1219_v4  ;;  %vm5031_vm1 = vmmov %vm5021_vm0  ;;  %v1345_v4 = vrot.slane %v4205_v57, 1  ;;  %v1320_v43 = vsel %vm3775_vm4, 0.0, %v4232_v35  ;;  %v1324_v55 = vsel %vm3801_vm6, 0.0, %v4264_v29  ;;  %v2169_v35 = vld [vmem:[%s4975_s5 + $0x10] sm:$0xff]  ;;  %v2172_v29 = vld [vmem:[%s4975_s5 + $0x28] sm:$0xff] }
 0x149   :  { %v4276_v48 = vsel %vm5031_vm1, %v1287_v27, %v1289_v38  ;;  %v1234_v28 = vmul.f32 0.5, %v1218_v31  ;;  %v1291_v61 = vrot.slane %v1248_v32, 7  ;;  %vm5032_vm14 = vmmov %vm5030_vm13  ;;  %vm5033_vm13 = vcmask 1046528  }
 0x14a   :  { %3210 = vmatmul.mubr.msk.f32.gmra.mrb[18].mxu1 %vm5032_vm14, %v4226_v10  ;;  %v4285_v52 = vmul.f32 %v1235_v40, %v4134_v1  ;;  %v4288_v37 = vsel %vm5033_vm13, %v1332_v16, %v1333_v59  ;;  %vm5034_vm15 = vmmov %vm5033_vm13  ;;  %v4307_v16 = vsel %vm5033_vm13, %v1337_v44, %v1339_v5  ;;  %v1349_v31 = vrot.slane %v4221_v26, 1  ;;  %v1786_v26 = vld [vmem:[%s4973_s3 + $0x98] sm:$0xff] }
 0x14b   :  { %v4291_v27 = vsel %vm5034_vm15, %v1333_v59, %v1335_v2  ;;  %vm5035_vm0 = vmmov %vm5032_vm14  ;;  %v1250_v13 = vmul.f32 %v1234_v28, %v4137_v36  ;;  %v4300_v3 = vsel %vm5031_vm1, %v1291_v61, %v1293_v42  ;;  %v1351_v40 = vrot.slane %v4237_v9, 1 }
 0x14c   :  { %3212 = vmatprep.mubr.msk.f32.mxu1 %vm5035_vm0, %v1248_v32  ;;  %vm5036_vm10 = vmmov %vm5031_vm1  ;;  %v1297_v1 = vrot.slane %v4285_v52, 7  ;;  %v1326_v63 = vsel %vm3814_vm7, 0.0, %v4270_v56  ;;  %v1381_v25 = vsel %vm3860_vm11, 0.0, %v4291_v27  ;;  %v1383_v39 = vsel %vm3873_vm12, 0.0, %v4307_v16  ;;  %v2173_v56 = vld [vmem:[%s4975_s5 + $0x30] sm:$0xff] }
 0x14d   :  { %v4297_v24 = vsel %vm5036_vm10, %v1289_v38, %v1291_v61  ;;  %vm5037_vm14 = vmmov %vm5033_vm13  ;;  %v1295_v41 = vrot.slane %v1250_v13, 7  ;;  %v1343_v38 = vrot.slane %v4194_v22, 1  ;;  %vm5040_vm10 = vcmask 523264   ;;  %v4484_v27 = vld [vmem:[%s4976_s4] ss:$0 sm:$0xff] }
 0x14e   :  { %v4304_v0 = vsel %vm5037_vm14, %v1335_v2, %v1337_v44  ;;  %vm5038_vm15 = vmmov %vm5031_vm1  ;;  %3213 = vmatmul.mubr.msk.f32.gmra.mrb[20].mxu1 %vm5040_vm10, %v4255_v14  ;;  %v1347_v2 = vrot.slane %v4208_v45, 1  ;;  %v1353_v22 = vrot.slane %v4226_v10, 1  ;;  %v1785_v45 = vld [vmem:[%s4973_s3 + $0x90] sm:$0xff]  ;;  %v1355_v44 = vrot.slane %v1248_v32, 1 }
 0x14f   :  { %v1315_v47 = vsel %vm5038_vm15, 0.0, %v1268_v30  ;;  %vm5039_vm0 = vmmov %vm5033_vm13  ;;  %v1328_v8 = vsel %vm3826_vm8, 0.0, %v4297_v24 }
 0x150   :  { %v4313_v36 = vsel %vm5039_vm0, %v1339_v5, %v1341_v19  ;;  %vm5041_vm1 = vmmov %vm5040_vm10  ;;  %v4330_v28 = vsel %vm5039_vm0, %v1343_v38, %v1345_v4  ;;  %v1316_v61 = vsel %vm3715_vm2, 0.0, %v1315_v47  ;;  %v1357_v5 = vrot.slane %v4255_v14, 1  ;;  %v1788_v14 = vld [vmem:[%s4973_s3 + $0xa8] sm:$0xff]  ;;  %v1789_v47 = vld [vmem:[%s4973_s3 + $0xb0] sm:$0xff] }
 0x151   :  { %3215 = vmatprep.mubr.msk.f32.mxu1 %vm5041_vm1, %v1250_v13  ;;  %vm5042_vm14 = vmmov %vm5038_vm15 }
 0x152   :  { %v1296_v51 = vsel %vm5042_vm14, %v1293_v42, %v1295_v41  ;;  %vm5043_vm13 = vmmov %vm5042_vm14 }
 0x153   :  { %v1298_v30 = vsel %vm5043_vm13, %v1295_v41, %v1297_v1  ;;  %vm5044_vm15 = vmmov %vm5039_vm0  ;;  %v1361_v1 = vrot.slane %v4285_v52, 1  ;;  %v3398_v41 = vpack.c.bf16 %v1786_v26, %v1785_v45 }
 0x154   :  { %v4326_v59 = vsel %vm5044_vm15, %v1341_v19, %v1343_v38  ;;  %vm5045_vm10 = vmmov %vm5039_vm0  ;;  %vm5049_vm15 = vcmask 523264   ;;  %v1359_v19 = vrot.slane %v1250_v13, 1  ;;  %v3402_v13 = vpack.c.bf16 %v1788_v14, %v1787_v33 }
 0x155   :  { %v4333_v57 = vsel %vm5045_vm10, %v1345_v4, %v1347_v2  ;;  %vm5046_vm1 = vmmov %vm5039_vm0  ;;  %3216 = vmatmul.mubr.msk.f32.gmra.mrb[22].mxu1 %vm5049_vm15, %v4285_v52  ;;  %v1318_v52 = vsel %vm3748_vm3, 0.0, %v4216_v7  ;;  %v1330_v7 = vsel %vm3839_vm9, 0.0, %v1296_v51 }
 0x156   :  { %v1350_v9 = vsel %vm5046_vm1, %v1347_v2, %v1349_v31  ;;  %vm5047_vm14 = vmmov %vm5039_vm0  ;;  %v1358_v4 = vsel %vm5046_vm1, %v1355_v44, %v1357_v5 }
 0x157   :  { %v4343_v42 = vsel %vm5047_vm14, %v1349_v31, %v1351_v40  ;;  %vm5048_vm13 = vmmov %vm5039_vm0  ;;  %v1790_v31 = vld [vmem:[%s4973_s3 + $0xb8] sm:$0xff] }
 0x158   :  { %v4346_v10 = vsel %vm5048_vm13, %v1351_v40, %v1353_v22  ;;  %vm5050_vm0 = vmmov %vm5049_vm15 }
 0x159   :  { %3234 = vmatprep.mubr.msk.f32.mxu1 %vm5050_vm0, %v1316_v61  ;;  %vm5051_vm10 = vmmov %vm5046_vm1 }
 0x15a   :  { %v1356_v38 = vsel %vm5051_vm10, %v1353_v22, %v1355_v44  ;;  %vm5052_vm14 = vmmov %vm5046_vm1 }
 0x15b   :  { %v1360_v2 = vsel %vm5052_vm14, %v1357_v5, %v1359_v19  ;;  %vm5053_vm2 = vmmov %vm5046_vm1 }
 0x15c   :  { %v1362_v32 = vsel %vm5053_vm2, %v1359_v19, %v1361_v1  ;;  %vm5054_vm13 = vmmov %vm5050_vm0 }
 0x15d   :  { %3235 = vmatmul.mubr.msk.f32.vlgmr.msra.gmra.mrb[8].mxu1 %vm5054_vm13, %v4200_v21  ;;  %vm5055_vm15 = vmmov %vm5050_vm0  ;;  %v3406_v21 = vpack.c.bf16 %v1790_v31, %v1789_v47 }
 0x15e   :  { %3237 = vmatprep.mubr.msk.f32.mxu1 %vm5055_vm15, %v1318_v52  ;;  %3397 = vmatpush3.bf16.msra.mxu1 %v4210_v23  ;;  %vm5056_vm3 = vmmov %vm5050_vm0  ;;  %v1322_v23 = vsel %vm3788_vm5, 0.0, %v4243_v58 }
 0x15f   :  { %3399 = vmatprep.subr.bf16.mxu1 %v3398_v41  ;;  %vm5057_vm10 = vmmov %vm5050_vm0 }
 0x160   :  { %vm5058_vm1 = vmmov %vm5050_vm0 }
 0x161   :  { %3238 = vmatmul.mubr.msk.f32.gmra.mrb[10].mxu1 %vm5050_vm0, %v4229_v54  ;;  %vm5059_vm14 = vmmov %vm5050_vm0 }
 0x162   :  { %3240 = vmatprep.mubr.msk.f32.mxu1 %vm5056_vm3, %v1320_v43  ;;  %3401 = vmatpush3.bf16.msra.mxu1 %v3398_v41  ;;  %vm5060_vm4 = vmmov %vm5050_vm0 }
 0x163   :  { %3403 = vmatprep.subr.bf16.mxu1 %v3402_v13  ;;  %vm5061_vm2 = vmmov %vm5050_vm0 }
 0x164   :  { %vm5062_vm5 = vmmov %vm5050_vm0 }
 0x165   :  { %3241 = vmatmul.mubr.msk.f32.gmra.mrb[12].mxu1 %vm5057_vm10, %v4240_v20  ;;  %vm5063_vm13 = vmmov %vm5050_vm0 }
 0x166   :  { %3243 = vmatprep.mubr.msk.f32.mxu1 %vm5058_vm1, %v1322_v23  ;;  %3405 = vmatpush3.bf16.msra.mxu1 %v3402_v13  ;;  %vm5064_vm6 = vmmov %vm5050_vm0 }
 0x167   :  { %3407 = vmatprep.subr.bf16.mxu1 %v3406_v21  ;;  %vm5065_vm15 = vmmov %vm5050_vm0 }
 0x168   :  { %vm5066_vm7 = vmmov %vm5050_vm0 }
 0x169   :  { %3244 = vmatmul.mubr.msk.f32.gmra.mrb[14].mxu1 %vm5059_vm14, %v4258_v62  ;;  %vm5067_vm3 = vmmov %vm5050_vm0  ;;  %vm5072_vm14 = vnez %v5009_v18  ;;  %v2171_v62 = vld [vmem:[%s4975_s5 + $0x20] sm:$0xff] }
 0x16a   :  { %3246 = vmatprep.mubr.msk.f32.mxu1 %vm5060_vm4, %v1324_v55  ;;  %3409 = vmatpush3.bf16.msra.mxu1 %v3406_v21  ;;  %vm5068_vm8 = vmmov %vm5050_vm0  ;;  %v1385_v50 = vsel %vm5072_vm14, 0.0, %v4326_v59  ;;  %vm5087_vm14 = vnez %v5019_v49  ;;  %v2170_v49 = vld [vmem:[%s4975_s5 + $0x18] sm:$0xff] }
 0x16b   :  { %vm5069_vm10 = vmmov %vm5050_vm0  ;;  %v3414_v58 = vpack.c.bf16 %v2170_v49, %v2169_v35 }
 0x16c   :  { %vm5070_vm9 = vmmov %vm5050_vm0 }
 0x16d   :  { %3247 = vmatmul.mubr.msk.f32.gmra.mrb[16].mxu1 %vm5061_vm2, %v4267_v11  ;;  %vm5071_vm1 = vmmov %vm5050_vm0  ;;  %vm5075_vm2 = vnez %v5011_v34  ;;  %v3418_v11 = vpack.c.bf16 %v2172_v29, %v2171_v62 }
 0x16e   :  { %3249 = vmatprep.mubr.msk.f32.mxu1 %vm5062_vm5, %v1326_v63  ;;  %vm5073_vm4 = vmmov %vm5050_vm0  ;;  %v1387_v15 = vsel %vm5075_vm2, 0.0, %v4333_v57 }
 0x16f   :  { %vm5074_vm11 = vmmov %vm5050_vm0 }
 0x170   :  { %vm5076_vm5 = vmmov %vm5050_vm0 }
 0x171   :  { %3250 = vmatmul.mubr.msk.f32.gmra.mrb[18].mxu1 %vm5063_vm13, %v4276_v48  ;;  %vm5077_vm12 = vmmov %vm5050_vm0  ;;  %vm5078_vm13 = vnez %v5013_v46  ;;  %v2174_v48 = vld [vmem:[%s4975_s5 + $0x38] sm:$0xff] }
 0x172   :  { %3252 = vmatprep.mubr.msk.f32.mxu1 %vm5064_vm6, %v1328_v8  ;;  %v1389_v6 = vsel %vm5078_vm13, 0.0, %v4343_v42  ;;  %vm5079_vm6 = vmmov %vm5050_vm0 }
 0x173   :  { %vm5090_vm2 = vmmov %vm5071_vm1 }
 0x174   :  { %vm5093_vm13 = vmmov %vm5071_vm1 }
 0x175   :  { %3253 = vmatmul.mubr.msk.f32.gmra.mrb[20].mxu1 %vm5065_vm15, %v4300_v3  ;;  %vm5080_vm15 = vmmov %vm5050_vm0 }
 0x176   :  { %3255 = vmatprep.mubr.msk.f32.mxu1 %vm5050_vm0, %v1330_v7  ;;  %vm5081_vm0 = vnez %v5015_v53  ;;  %v2167_v53 = vld [vmem:[%s4975_s5] sm:$0xff] }
 0x177   :  { %v1391_v18 = vsel %vm5081_vm0, 0.0, %v1356_v38  ;;  %vm5096_vm0 = vmmov %vm5071_vm1 }
 0x179   :  { %3256 = vmatmul.mubr.msk.f32.gmra.mrb[22].mxu1 %vm5066_vm7, %v1298_v30  ;;  %vm5082_vm7 = vmmov %vm5071_vm1 }
 0x17a   :  { %3274 = vmatprep.mubr.msk.f32.mxu1 %vm5067_vm3, %v4288_v37  ;;  %vm5083_vm3 = vmmov %vm5071_vm1  ;;  %v3422_v37 = vpack.c.bf16 %v2174_v48, %v2173_v56 }
 0x17d   :  { %3275 = vmatmul.mubr.msk.f32.vlgmr.msra.gmra.mrb[8].mxu1 %vm5068_vm8, %v1381_v25  ;;  %vm5084_vm8 = vnez %v5017_v60  ;;  %v2168_v60 = vld [vmem:[%s4975_s5 + $0x8] sm:$0xff] }
 0x17e   :  { %3277 = vmatprep.mubr.msk.f32.mxu1 %vm5069_vm10, %v4304_v0  ;;  %v1393_v34 = vsel %vm5084_vm8, 0.0, %v1360_v2  ;;  %vm5085_vm10 = vmmov %vm5071_vm1  ;;  %v3410_v20 = vpack.c.bf16 %v2168_v60, %v2167_v53 }
 0x17f   :  { %vm5099_vm8 = vmmov %vm5096_vm0 }
 0x180   :  { %3411 = vmatprep.subr.bf16.mxu0 %v3410_v20 }
 0x181   :  { %3278 = vmatmul.mubr.msk.f32.gmra.mrb[10].mxu1 %vm5070_vm9, %v1383_v39  ;;  %vm5086_vm9 = vcmask 1046528   ;;  %3413 = vmatpush3.bf16.msra.mxu0 %v3410_v20 }
 0x182   :  { %3280 = vmatprep.mubr.msk.f32.mxu1 %vm5071_vm1, %v4313_v36  ;;  %v1379_v46 = vsel %vm5086_vm9, %v1361_v1, 0.0  ;;  %3415 = vmatprep.subr.bf16.mxu0 %v3414_v58  ;;  %vm5101_vm9 = vmmov %vm5096_vm0 }
 0x183   :  { %v1395_v54 = vsel %vm5087_vm14, 0.0, %v1379_v46  ;;  %vm5103_vm14 = vmmov %vm5096_vm0 }
 0x185   :  { %3281 = vmatmul.mubr.msk.f32.gmra.mrb[12].mxu1 %vm5073_vm4, %v1385_v50  ;;  %vm5088_vm4 = vmmov %vm5071_vm1  ;;  %3417 = vmatpush3.bf16.msra.mxu0 %v3414_v58 }
 0x186   :  { %3283 = vmatprep.mubr.msk.f32.mxu1 %vm5074_vm11, %v4330_v28  ;;  %3419 = vmatprep.subr.bf16.mxu0 %v3418_v11  ;;  %vm5089_vm11 = vmmov %vm5071_vm1 }
 0x189   :  { %3284 = vmatmul.mubr.msk.f32.gmra.mrb[14].mxu1 %vm5076_vm5, %v1387_v15  ;;  %3421 = vmatpush3.bf16.msra.mxu0 %v3418_v11  ;;  %vm5091_vm5 = vmmov %vm5071_vm1 }
 0x18a   :  { %3286 = vmatprep.mubr.msk.f32.mxu1 %vm5077_vm12, %v1350_v9  ;;  %3423 = vmatprep.subr.bf16.mxu0 %v3422_v37  ;;  %vm5092_vm12 = vmmov %vm5071_vm1 }
 0x18d   :  { %3287 = vmatmul.mubr.msk.f32.gmra.mrb[16].mxu1 %vm5079_vm6, %v1389_v6  ;;  %3425 = vmatpush3.bf16.msra.mxu0 %v3422_v37  ;;  %vm5094_vm6 = vmmov %vm5071_vm1 }
 0x18e   :  { %3289 = vmatprep.mubr.msk.f32.mxu1 %vm5080_vm15, %v4346_v10  ;;  %vm5095_vm15 = vmmov %vm5071_vm1 }
 0x191   :  { %3290 = vmatmul.mubr.msk.f32.gmra.mrb[18].mxu1 %vm5082_vm7, %v1391_v18  ;;  %vm5097_vm7 = vmmov %vm5096_vm0 }
 0x192   :  { %3292 = vmatprep.mubr.msk.f32.mxu1 %vm5083_vm3, %v1358_v4  ;;  %vm5098_vm3 = vmmov %vm5096_vm0 }
 0x195   :  { %3293 = vmatmul.mubr.msk.f32.gmra.mrb[20].mxu1 %vm5085_vm10, %v1393_v34  ;;  %vm5100_vm10 = vmmov %vm5096_vm0 }
 0x196   :  { %3295 = vmatprep.mubr.msk.f32.mxu1 %vm5071_vm1, %v1362_v32  ;;  %vm5102_vm1 = vmmov %vm5096_vm0 }
 0x199   :  { %3296 = vmatmul.mubr.msk.f32.gmra.mrb[22].mxu1 %vm5088_vm4, %v1395_v54  ;;  %vm5104_vm4 = vmmov %vm5096_vm0 }
 0x250   :  { %v3276_v24 = vpop.f32.mrb[8].mxu1 }
 0x251   :  { %v4487_v3 = vadd.f32 %v3276_v24, %v4484_v27  ;;  %v1905_v0 = vpop.f32.mrb[9].mxu1 }
 0x252   :  { %v4490_v16 = vadd.f32 %v4484_v27, %v1905_v0 }
 0x253   :  { %v2024_v36 = vmul.f32 %v4487_v3, %v4487_v3 }
 0x254   :  { %v2023_v40 = vmul.f32 %v4490_v16, %v4490_v16  ;;  %v3279_v51 = vpop.f32.mrb[10].mxu1 }
 0x255   :  { %v2040_v30 = vmul.f32 %v2024_v36, %v4487_v3  ;;  %v4498_v59 = vadd.f32 %v3279_v51, %v4484_v27  ;;  %v1915_v22 = vpop.f32.mrb[11].mxu1 }
 0x256   :  { %v2039_v28 = vmul.f32 %v2023_v40, %v4490_v16  ;;  %v4502_v57 = vadd.f32 %v4484_v27, %v1915_v22 }
 0x257   :  { %v2056_v45 = vmul.f32 0.044715, %v2040_v30  ;;  %v2026_v26 = vmul.f32 %v4498_v59, %v4498_v59 }
 0x258   :  { %v2055_v9 = vmul.f32 0.044715, %v2039_v28  ;;  %v2025_v42 = vmul.f32 %v4502_v57, %v4502_v57  ;;  %v3282_v10 = vpop.f32.mrb[12].mxu1 }
 0x259   :  { %v2072_v61 = vadd.f32 %v2056_v45, %v4487_v3  ;;  %v2042_v44 = vmul.f32 %v2026_v26, %v4498_v59  ;;  %v4511_v5 = vadd.f32 %v3282_v10, %v4484_v27  ;;  %v1925_v19 = vpop.f32.mrb[13].mxu1 }
 0x25a   :  { %v2071_v1 = vadd.f32 %v2055_v9, %v4490_v16  ;;  %v2041_v41 = vmul.f32 %v2025_v42, %v4502_v57  ;;  %v4516_v38 = vadd.f32 %v4484_v27, %v1925_v19 }
 0x25b   :  { %v2088_v4 = vmul.f32 0.7978846, %v2072_v61  ;;  %v2058_v2 = vmul.f32 0.044715, %v2042_v44  ;;  %v2028_v33 = vmul.f32 %v4511_v5, %v4511_v5 }
 0x25c   :  { %v2087_v14 = vmul.f32 0.7978846, %v2071_v1  ;;  %v2057_v32 = vmul.f32 0.044715, %v2041_v41  ;;  %v2027_v52 = vmul.f32 %v4516_v38, %v4516_v38  ;;  %v3285_v13 = vpop.f32.mrb[14].mxu1 }
 0x25d   :  { %3526 = vtanh.f32 %v2088_v4  ;;  %v2074_v47 = vadd.f32 %v2058_v2, %v4498_v59  ;;  %v2044_v31 = vmul.f32 %v2028_v33, %v4511_v5  ;;  %v4525_v43 = vadd.f32 %v3285_v13, %v4484_v27  ;;  %v1935_v21 = vpop.f32.mrb[15].mxu1 }
 0x25e   :  { %v2073_v23 = vadd.f32 %v2057_v32, %v4502_v57  ;;  %v2043_v55 = vmul.f32 %v2027_v52, %v4516_v38  ;;  %v4530_v63 = vadd.f32 %v4484_v27, %v1935_v21  ;;  %3528 = vtanh.f32 %v2087_v14 }
 0x25f   :  { %v2060_v8 = vmul.f32 0.044715, %v2044_v31  ;;  %v2030_v7 = vmul.f32 %v4525_v43, %v4525_v43  ;;  %v2090_v6 = vmul.f32 0.7978846, %v2074_v47 }
 0x260   :  { %v2089_v25 = vmul.f32 0.7978846, %v2073_v23  ;;  %v2059_v39 = vmul.f32 0.044715, %v2043_v55  ;;  %v2029_v50 = vmul.f32 %v4530_v63, %v4530_v63  ;;  %v3288_v15 = vpop.f32.mrb[16].mxu1 }
 0x261   :  { %v2076_v18 = vadd.f32 %v2060_v8, %v4511_v5  ;;  %v2046_v34 = vmul.f32 %v2030_v7, %v4525_v43  ;;  %v4539_v46 = vadd.f32 %v3288_v15, %v4484_v27  ;;  %v1945_v54 = vpop.f32.mrb[17].mxu1 }
 0x262   :  { %v2075_v53 = vadd.f32 %v2059_v39, %v4516_v38  ;;  %v2045_v60 = vmul.f32 %v2029_v50, %v4530_v63  ;;  %v4544_v35 = vadd.f32 %v4484_v27, %v1945_v54  ;;  %3530 = vtanh.f32 %v2089_v25 }
 0x263   :  { %v2092_v20 = vmul.f32 0.7978846, %v2076_v18  ;;  %v2062_v49 = vmul.f32 0.044715, %v2046_v34  ;;  %v2032_v58 = vmul.f32 %v4539_v46, %v4539_v46  ;;  %3532 = vtanh.f32 %v2090_v6 }
 0x264   :  { %v2091_v62 = vmul.f32 0.7978846, %v2075_v53  ;;  %v2061_v29 = vmul.f32 0.044715, %v2045_v60  ;;  %v2031_v11 = vmul.f32 %v4544_v35, %v4544_v35  ;;  %v3291_v56 = vpop.f32.mrb[18].mxu1 }
 0x265   :  { %v2078_v48 = vadd.f32 %v2062_v49, %v4525_v43  ;;  %v2048_v37 = vmul.f32 %v2032_v58, %v4539_v46  ;;  %v4553_v24 = vadd.f32 %v3291_v56, %v4484_v27  ;;  %v1955_v0 = vpop.f32.mrb[19].mxu1 }
 0x266   :  { %3534 = vtanh.f32 %v2091_v62  ;;  %v2077_v36 = vadd.f32 %v2061_v29, %v4530_v63  ;;  %v2047_v40 = vmul.f32 %v2031_v11, %v4544_v35  ;;  %v4558_v51 = vadd.f32 %v4484_v27, %v1955_v0 }
 0x267   :  { %v3527_v30 = vpop.eup %3526  ;;  %3536 = vtanh.f32 %v2092_v20  ;;  %v2094_v22 = vmul.f32 0.7978846, %v2078_v48  ;;  %v2064_v28 = vmul.f32 0.044715, %v2048_v37  ;;  %v2034_v45 = vmul.f32 %v4553_v24, %v4553_v24 }
 0x268   :  { %v2120_v26 = vadd.f32 1.0, %v3527_v30  ;;  %v2093_v9 = vmul.f32 0.7978846, %v2077_v36  ;;  %v2063_v42 = vmul.f32 0.044715, %v2047_v40  ;;  %v2033_v10 = vmul.f32 %v4558_v51, %v4558_v51  ;;  %v3294_v61 = vpop.f32.mrb[20].mxu1  ;;  %v3529_v44 = vpop.eup %3528 }
 0x269   :  { %3538 = vtanh.f32 %v2094_v22  ;;  %v2080_v19 = vadd.f32 %v2064_v28, %v4539_v46  ;;  %v2050_v1 = vmul.f32 %v2034_v45, %v4553_v24  ;;  %v4567_v41 = vadd.f32 %v3294_v61, %v4484_v27  ;;  %v1965_v4 = vpop.f32.mrb[21].mxu1 }
 0x26a   :  { %v2136_v2 = vmul.f32 0.5, %v2120_v26  ;;  %3540 = vtanh.f32 %v2093_v9  ;;  %v2079_v33 = vadd.f32 %v2063_v42, %v4544_v35  ;;  %v2049_v14 = vmul.f32 %v2033_v10, %v4558_v51 }
 0x26b   :  { %v2096_v32 = vmul.f32 0.7978846, %v2080_v19  ;;  %v2066_v52 = vmul.f32 0.044715, %v2050_v1  ;;  %v2036_v13 = vmul.f32 %v4567_v41, %v4567_v41  ;;  %v4574_v47 = vadd.f32 %v4484_v27, %v1965_v4 }
 0x26c   :  { %v2152_v31 = vmul.f32 %v2136_v2, %v4487_v3  ;;  %v2095_v21 = vmul.f32 0.7978846, %v2079_v33  ;;  %v2065_v23 = vmul.f32 0.044715, %v2049_v14  ;;  %v3297_v55 = vpop.f32.mrb[22].mxu1  ;;  %v2119_v8 = vadd.f32 1.0, %v3529_v44  ;;  %v3531_v7 = vpop.eup %3530 }
 0x26d   :  { %3542 = vtanh.f32 %v2096_v32  ;;  %v2082_v25 = vadd.f32 %v2066_v52, %v4553_v24  ;;  %v2052_v39 = vmul.f32 %v2036_v13, %v4567_v41  ;;  %v2035_v50 = vmul.f32 %v4574_v47, %v4574_v47  ;;  %v1975_v15 = vpop.f32.mrb[23].mxu1  ;;  %v3533_v34 = vpop.eup %3532 }
 0x26e   :  { %3544 = vtanh.f32 %v2095_v21  ;;  %v2081_v6 = vadd.f32 %v2065_v23, %v4558_v51  ;;  %v4583_v18 = vadd.f32 %v3297_v55, %v4484_v27  ;;  %v4586_v3 = vadd.f32 %v4484_v27, %v1975_v15 }
 0x26f   :  { %v2098_v54 = vmul.f32 0.7978846, %v2082_v25  ;;  %v2068_v53 = vmul.f32 0.044715, %v2052_v39  ;;  %v2051_v60 = vmul.f32 %v2035_v50, %v4574_v47  ;;  %v2135_v20 = vmul.f32 0.5, %v2119_v8 }
 0x270   :  { %v3535_v49 = vpop.eup %3534  ;;  %v2097_v58 = vmul.f32 0.7978846, %v2081_v6  ;;  %v2038_v62 = vmul.f32 %v4583_v18, %v4583_v18  ;;  %v2037_v29 = vmul.f32 %v4586_v3, %v4586_v3  ;;  %v2121_v11 = vadd.f32 1.0, %v3531_v7 }
 0x271   :  { %v3537_v56 = vpop.eup %3536  ;;  %3546 = vtanh.f32 %v2098_v54  ;;  %v2084_v27 = vadd.f32 %v2068_v53, %v4567_v41  ;;  %v2067_v48 = vmul.f32 0.044715, %v2051_v60  ;;  %v2151_v37 = vmul.f32 %v2135_v20, %v4490_v16 }
 0x272   :  { %3548 = vtanh.f32 %v2097_v58  ;;  %v2054_v0 = vmul.f32 %v2038_v62, %v4583_v18  ;;  %v2053_v36 = vmul.f32 %v2037_v29, %v4586_v3  ;;  %v2137_v40 = vmul.f32 0.5, %v2121_v11 }
 0x273   :  { %v3539_v30 = vpop.eup %3538  ;;  %v2100_v22 = vmul.f32 0.7978846, %v2084_v27  ;;  %v2083_v28 = vadd.f32 %v2067_v48, %v4574_v47  ;;  %3314 = vmatprep.mubr.msk.f32.mxu0 %vm5089_vm11, %v2151_v37  ;;  %v2122_v45 = vadd.f32 1.0, %v3533_v34  ;;  %v2123_v26 = vadd.f32 1.0, %v3535_v49 }
 0x274   :  { %v3541_v9 = vpop.eup %3540  ;;  %v2070_v42 = vmul.f32 0.044715, %v2054_v0  ;;  %v2069_v10 = vmul.f32 0.044715, %v2053_v36  ;;  %3315 = vmatmul.mubr.msk.f32.vlgmr.msra.gmra.mrb[16].mxu0 %vm5090_vm2, %v2152_v31  ;;  %v2153_v16 = vmul.f32 %v2137_v40, %v4502_v57  ;;  %v2124_v61 = vadd.f32 1.0, %v3537_v56 }
 0x275   :  { %3550 = vtanh.f32 %v2100_v22  ;;  %v2099_v44 = vmul.f32 0.7978846, %v2083_v28  ;;  %v2138_v19 = vmul.f32 0.5, %v2122_v45  ;;  %v2139_v1 = vmul.f32 0.5, %v2123_v26 }
 0x276   :  { %v2086_v4 = vadd.f32 %v2070_v42, %v4583_v18  ;;  %v2085_v2 = vadd.f32 %v2069_v10, %v4586_v3  ;;  %3317 = vmatprep.mubr.msk.f32.mxu0 %vm5091_vm5, %v2153_v16  ;;  %v2140_v33 = vmul.f32 0.5, %v2124_v61  ;;  %v2125_v14 = vadd.f32 1.0, %v3541_v9 }
 0x277   :  { %v3543_v32 = vpop.eup %3542  ;;  %3552 = vtanh.f32 %v2099_v44  ;;  %v2154_v52 = vmul.f32 %v2138_v19, %v4498_v59  ;;  %v2155_v13 = vmul.f32 %v2139_v1, %v4516_v38  ;;  %v2126_v57 = vadd.f32 1.0, %v3539_v30 }
 0x278   :  { %v3545_v31 = vpop.eup %3544  ;;  %v2102_v21 = vmul.f32 0.7978846, %v2086_v4  ;;  %v2101_v23 = vmul.f32 0.7978846, %v2085_v2  ;;  %v2141_v55 = vmul.f32 0.5, %v2125_v14  ;;  %v2156_v7 = vmul.f32 %v2140_v33, %v4511_v5 }
 0x279   :  { %3318 = vmatmul.mubr.msk.f32.gmra.mrb[18].mxu0 %vm5092_vm12, %v2154_v52  ;;  %v2127_v8 = vadd.f32 1.0, %v3545_v31  ;;  %v2142_v59 = vmul.f32 0.5, %v2126_v57  ;;  %v2128_v38 = vadd.f32 1.0, %v3543_v32 }
 0x27a   :  { %3554 = vtanh.f32 %v2102_v21  ;;  %3320 = vmatprep.mubr.msk.f32.mxu0 %vm5093_vm13, %v2155_v13  ;;  %v2157_v25 = vmul.f32 %v2141_v55, %v4530_v63 }
 0x27b   :  { %v3547_v39 = vpop.eup %3546  ;;  %3556 = vtanh.f32 %v2101_v23  ;;  %v2143_v50 = vmul.f32 0.5, %v2127_v8  ;;  %v2158_v53 = vmul.f32 %v2142_v59, %v4525_v43  ;;  %v2144_v60 = vmul.f32 0.5, %v2128_v38 }
 0x27c   :  { %v3549_v15 = vpop.eup %3548  ;;  %v2130_v20 = vadd.f32 1.0, %v3547_v39 }
 0x27d   :  { %3321 = vmatmul.mubr.msk.f32.gmra.mrb[20].mxu0 %vm5094_vm6, %v2156_v7  ;;  %v2129_v6 = vadd.f32 1.0, %v3549_v15  ;;  %v2159_v34 = vmul.f32 %v2143_v50, %v4544_v35  ;;  %v2160_v62 = vmul.f32 %v2144_v60, %v4539_v46  ;;  %v4667_v50 = vand.u32 127, %v42_v12 }
 0x27e   :  { %3323 = vmatprep.mubr.msk.f32.mxu0 %vm5095_vm15, %v2157_v25  ;;  %v2146_v29 = vmul.f32 0.5, %v2130_v20 }
 0x27f   :  { %v3551_v54 = vpop.eup %3550  ;;  %v2145_v5 = vmul.f32 0.5, %v2129_v6 }
 0x280   :  { %v2132_v11 = vadd.f32 1.0, %v3551_v54  ;;  %v2162_v37 = vmul.f32 %v2146_v29, %v4553_v24  ;;  %v2909_v24 = vld [vmem:[%s4977_s6] ss:$0 sm:$0xff] }
 0x281   :  { %v3553_v63 = vpop.eup %3552  ;;  %3324 = vmatmul.mubr.msk.f32.gmra.mrb[22].mxu0 %vm5096_vm0, %v2158_v53  ;;  %v2161_v49 = vmul.f32 %v2145_v5, %v4558_v51 }
 0x282   :  { %3326 = vmatprep.mubr.msk.f32.mxu0 %vm5097_vm7, %v2159_v34  ;;  %v2131_v58 = vadd.f32 1.0, %v3553_v63  ;;  %v2148_v0 = vmul.f32 0.5, %v2132_v11 }
 0x284   :  { %v3555_v56 = vpop.eup %3554  ;;  %v2147_v35 = vmul.f32 0.5, %v2131_v58  ;;  %v2164_v40 = vmul.f32 %v2148_v0, %v4567_v41 }
 0x285   :  { %v3557_v27 = vpop.eup %3556  ;;  %3327 = vmatmul.mubr.msk.f32.gmra.mrb[24].mxu0 %vm5098_vm3, %v2160_v62  ;;  %v2134_v36 = vadd.f32 1.0, %v3555_v56 }
 0x286   :  { %3329 = vmatprep.mubr.msk.f32.mxu0 %vm5099_vm8, %v2161_v49  ;;  %v2163_v43 = vmul.f32 %v2147_v35, %v4574_v47  ;;  %v2133_v48 = vadd.f32 1.0, %v3557_v27 }
 0x287   :  { %v2150_v30 = vmul.f32 0.5, %v2134_v36 }
 0x288   :  { %v2149_v51 = vmul.f32 0.5, %v2133_v48 }
 0x289   :  { %3330 = vmatmul.mubr.msk.f32.gmra.mrb[26].mxu0 %vm5100_vm10, %v2162_v37  ;;  %v2166_v47 = vmul.f32 %v2150_v30, %v4583_v18 }
 0x28a   :  { %3332 = vmatprep.mubr.msk.f32.mxu0 %vm5101_vm9, %v2163_v43  ;;  %v2165_v46 = vmul.f32 %v2149_v51, %v4586_v3 }
 0x28d   :  { %3333 = vmatmul.mubr.msk.f32.gmra.mrb[28].mxu0 %vm5102_vm1, %v2164_v40 }
 0x28e   :  { %3335 = vmatprep.mubr.msk.f32.mxu0 %vm5103_vm14, %v2165_v46 }
 0x291   :  { %3336 = vmatmul.mubr.msk.f32.gmra.mrb[30].mxu0 %vm5104_vm4, %v2166_v47 }
 0x347   :  { %v3316_v22 = vpop.f32.mrb[16].mxu0 }
 0x348   :  { %v2302_v28 = vadd.f32 %v3316_v22, %v2909_v24  ;;  %v2296_v45 = vpop.f32.mrb[17].mxu0 }
 0x349   :  { %v2297_v3 = vadd.f32 %v2909_v24, %v2296_v45 }
 0x34a   :  { %2377 = vmax.xlane.f32.xlu0 %v2302_v28 }
 0x34c   :  { %v3319_v26 = vpop.f32.mrb[18].mxu0 }
 0x34d   :  { %v2312_v41 = vadd.f32 %v3319_v26, %v2909_v24  ;;  %v2306_v9 = vpop.f32.mrb[19].mxu0 }
 0x34e   :  { %2375 = vmax.xlane.f32.xlu0 %v2297_v3  ;;  %v2307_v10 = vadd.f32 %v2909_v24, %v2306_v9 }
 0x34f   :  { %2381 = vmax.xlane.f32.xlu1 %v2312_v41 }
 0x350   :  { %v3322_v42 = vpop.f32.mrb[20].mxu0 }
 0x351   :  { %v2316_v16 = vpop.f32.mrb[21].mxu0  ;;  %v4633_v44 = vadd.f32 %v3322_v42, %v2909_v24 }
 0x352   :  { %v2317_v18 = vadd.f32 %v2909_v24, %v2316_v16 }
 0x353   :  { %2379 = vmax.xlane.f32.xlu1 %v2307_v10 }
 0x354   :  { %2383 = vmax.xlane.f32.xlu0 %v2317_v18  ;;  %v3325_v61 = vpop.f32.mrb[22].mxu0 }
 0x355   :  { %v2326_v19 = vpop.f32.mrb[23].mxu0  ;;  %v4639_v2 = vadd.f32 %v3325_v61, %v2909_v24 }
 0x356   :  { %v4635_v1 = vadd.f32 %v2909_v24, %v2326_v19 }
 0x357   :  { %2385 = vmax.xlane.f32.xlu1 %v4633_v44 }
 0x358   :  { %2387 = vmax.xlane.f32.xlu0 %v4635_v1  ;;  %v3328_v4 = vpop.f32.mrb[24].mxu0 }
 0x359   :  { %v2336_v33 = vpop.f32.mrb[25].mxu0  ;;  %v4645_v52 = vadd.f32 %v3328_v4, %v2909_v24 }
 0x35a   :  { %v4641_v14 = vadd.f32 %v2909_v24, %v2336_v33 }
 0x35b   :  { %2389 = vmax.xlane.f32.xlu1 %v4639_v2 }
 0x35c   :  { %2391 = vmax.xlane.f32.xlu0 %v4641_v14  ;;  %v3331_v32 = vpop.f32.mrb[26].mxu0 }
 0x35d   :  { %v2346_v13 = vpop.f32.mrb[27].mxu0  ;;  %v4651_v21 = vadd.f32 %v3331_v32, %v2909_v24 }
 0x35e   :  { %v4647_v57 = vadd.f32 %v2909_v24, %v2346_v13 }
 0x35f   :  { %2393 = vmax.xlane.f32.xlu1 %v4645_v52 }
 0x360   :  { %2395 = vmax.xlane.f32.xlu0 %v4647_v57  ;;  %v3334_v31 = vpop.f32.mrb[28].mxu0 }
 0x361   :  { %v2356_v23 = vpop.f32.mrb[29].mxu0  ;;  %v4657_v7 = vadd.f32 %v3334_v31, %v2909_v24 }
 0x362   :  { %v4653_v55 = vadd.f32 %v2909_v24, %v2356_v23 }
 0x363   :  { %2397 = vmax.xlane.f32.xlu1 %v4651_v21 }
 0x364   :  { %2399 = vmax.xlane.f32.xlu0 %v4653_v55  ;;  %v3337_v8 = vpop.f32.mrb[30].mxu0 }
 0x365   :  { %v2366_v25 = vpop.f32.mrb[31].mxu0  ;;  %v4663_v59 = vadd.f32 %v3337_v8, %v2909_v24 }
 0x366   :  { %v4659_v39 = vadd.f32 %v2909_v24, %v2366_v25 }
 0x367   :  { %2401 = vmax.xlane.f32.xlu1 %v4657_v7 }
 0x368   :  { %2403 = vmax.xlane.f32.xlu0 %v4659_v39 }
 0x36b   :  { %2405 = vmax.xlane.f32.xlu1 %v4663_v59 }
 0x3d7   :  { %v2378_v38 = vpop.xlane.xlu0 %2377 }
 0x3d8   :  { %vm2410_vm11 = vcmp.ge.f32.partialorder %v2302_v28, %v2378_v38 }
 0x3d9   :  { %v4670_v15 = vsel %vm2410_vm11, %v4667_v50, 128 }
 0x3da   :  { %v2456_v6 = vshra.s32 %v4670_v15, 16 }
 0x3db   :  { %v2376_v34 = vpop.xlane.xlu0 %2375 }
 0x3dc   :  { %vm2409_vm2 = vcmp.ge.f32.partialorder %v2297_v3, %v2376_v34  ;;  %v2382_v54 = vpop.xlane.xlu1 %2381  ;;  %v4673_v53 = vcvt.s32.f32 %v2456_v6 }
 0x3dd   :  { %v4676_v60 = vsel %vm2409_vm2, %v4667_v50, 128  ;;  %vm2412_vm5 = vcmp.ge.f32.partialorder %v2312_v41, %v2382_v54 }
 0x3de   :  { %v4679_v5 = vsel %vm2412_vm5, %v4667_v50, 128  ;;  %2459 = vmin.xlane.f32.xlu1 %v4673_v53  ;;  %v2442_v12 = vshra.s32 %v4676_v60, 16  ;;  %v2441_v54 = vand.u32 65535, %v4676_v60 }
 0x3df   :  { %v2484_v20 = vshra.s32 %v4679_v5, 16 }
 0x3e0   :  { %v2380_v63 = vpop.xlane.xlu1 %2379  ;;  %v4684_v49 = vcvt.s32.f32 %v2442_v12 }
 0x3e1   :  { %vm2411_vm12 = vcmp.ge.f32.partialorder %v2307_v10, %v2380_v63  ;;  %v2384_v58 = vpop.xlane.xlu0 %2383  ;;  %v4686_v62 = vcvt.s32.f32 %v2484_v20  ;;  %v2483_v63 = vand.u32 65535, %v4679_v5 }
 0x3e2   :  { %v4689_v29 = vsel %vm2411_vm12, %v4667_v50, 128  ;;  %vm2413_vm13 = vcmp.ge.f32.partialorder %v2317_v18, %v2384_v58  ;;  %2445 = vmin.xlane.f32.xlu0 %v4684_v49 }
 0x3e3   :  { %v4693_v11 = vsel %vm2413_vm13, %v4667_v50, 128  ;;  %2487 = vmin.xlane.f32.xlu1 %v4686_v62  ;;  %v2470_v56 = vshra.s32 %v4689_v29, 16 }
 0x3e4   :  { %v2386_v35 = vpop.xlane.xlu1 %2385  ;;  %v2498_v48 = vshra.s32 %v4693_v11, 16 }
 0x3e5   :  { %vm2414_vm6 = vcmp.ge.f32.partialorder %v4633_v44, %v2386_v35  ;;  %v2388_v27 = vpop.xlane.xlu0 %2387  ;;  %v4698_v43 = vcvt.s32.f32 %v2470_v56  ;;  %v2443_v35 = vcvt.s32.f32 %v2441_v54 }
 0x3e6   :  { %v4702_v37 = vsel %vm2414_vm6, %v4667_v50, 128  ;;  %vm2415_vm15 = vcmp.ge.f32.partialorder %v4635_v1, %v2388_v27  ;;  %v4713_v30 = vcvt.s32.f32 %v2498_v48  ;;  %v2469_v27 = vand.u32 65535, %v4689_v29 }
 0x3e7   :  { %v4706_v0 = vsel %vm2415_vm15, %v4667_v50, 128  ;;  %2473 = vmin.xlane.f32.xlu0 %v4698_v43  ;;  %v2512_v36 = vshra.s32 %v4702_v37, 16 }
 0x3e8   :  { %v2390_v51 = vpop.xlane.xlu1 %2389  ;;  %v2526_v47 = vshra.s32 %v4706_v0, 16  ;;  %v2471_v29 = vcvt.s32.f32 %v2469_v27 }
 0x3e9   :  { %vm2416_vm0 = vcmp.ge.f32.partialorder %v4639_v2, %v2390_v51  ;;  %v2392_v46 = vpop.xlane.xlu0 %2391  ;;  %v4711_v40 = vcvt.s32.f32 %v2512_v36  ;;  %v2511_v36 = vand.u32 65535, %v4702_v37 }
 0x3ea   :  { %v4717_v24 = vsel %vm2416_vm0, %v4667_v50, 128  ;;  %vm2417_vm7 = vcmp.ge.f32.partialorder %v4641_v14, %v2392_v46  ;;  %v4729_v41 = vcvt.s32.f32 %v2526_v47 }
 0x3eb   :  { %v4721_v22 = vsel %vm2417_vm7, %v4667_v50, 128  ;;  %2515 = vmin.xlane.f32.xlu1 %v4711_v40  ;;  %2501 = vmin.xlane.f32.xlu0 %v4713_v30  ;;  %v2540_v28 = vshra.s32 %v4717_v24, 16 }
 0x3ec   :  { %v2394_v45 = vpop.xlane.xlu1 %2393  ;;  %v2554_v9 = vshra.s32 %v4721_v22, 16 }
 0x3ed   :  { %vm2418_vm3 = vcmp.ge.f32.partialorder %v4645_v52, %v2394_v45  ;;  %v2396_v3 = vpop.xlane.xlu0 %2395  ;;  %v4727_v26 = vcvt.s32.f32 %v2540_v28  ;;  %v2513_v45 = vcvt.s32.f32 %v2511_v36 }
 0x3ee   :  { %v4733_v42 = vsel %vm2418_vm3, %v4667_v50, 128  ;;  %vm2419_vm8 = vcmp.ge.f32.partialorder %v4647_v57, %v2396_v3  ;;  %v4745_v19 = vcvt.s32.f32 %v2554_v9 }
 0x3ef   :  { %v4737_v10 = vsel %vm2419_vm8, %v4667_v50, 128  ;;  %2543 = vmin.xlane.f32.xlu1 %v4727_v26  ;;  %2529 = vmin.xlane.f32.xlu0 %v4729_v41  ;;  %v2568_v16 = vshra.s32 %v4733_v42, 16 }
 0x3f0   :  { %v2398_v18 = vpop.xlane.xlu1 %2397  ;;  %v2582_v1 = vshra.s32 %v4737_v10, 16 }
 0x3f1   :  { %vm2420_vm10 = vcmp.ge.f32.partialorder %v4651_v21, %v2398_v18  ;;  %v2400_v61 = vpop.xlane.xlu0 %2399  ;;  %v4743_v44 = vcvt.s32.f32 %v2568_v16 }
 0x3f2   :  { %v4749_v4 = vsel %vm2420_vm10, %v4667_v50, 128  ;;  %vm2421_vm9 = vcmp.ge.f32.partialorder %v4653_v55, %v2400_v61  ;;  %v4761_v13 = vcvt.s32.f32 %v2582_v1 }
 0x3f3   :  { %v4753_v2 = vsel %vm2421_vm9, %v4667_v50, 128  ;;  %2571 = vmin.xlane.f32.xlu1 %v4743_v44  ;;  %2557 = vmin.xlane.f32.xlu0 %v4745_v19  ;;  %v2596_v33 = vshra.s32 %v4749_v4, 16 }
 0x3f4   :  { %v2402_v14 = vpop.xlane.xlu1 %2401  ;;  %v2610_v57 = vshra.s32 %v4753_v2, 16 }
 0x3f5   :  { %vm2422_vm1 = vcmp.ge.f32.partialorder %v4657_v7, %v2402_v14  ;;  %v2404_v32 = vpop.xlane.xlu0 %2403  ;;  %v4759_v52 = vcvt.s32.f32 %v2596_v33 }
 0x3f6   :  { %v4765_v31 = vsel %vm2422_vm1, %v4667_v50, 128  ;;  %vm2423_vm14 = vcmp.ge.f32.partialorder %v4659_v39, %v2404_v32  ;;  %v4777_v7 = vcvt.s32.f32 %v2610_v57 }
 0x3f7   :  { %v4769_v21 = vsel %vm2423_vm14, %v4667_v50, 128  ;;  %2599 = vmin.xlane.f32.xlu1 %v4759_v52  ;;  %2585 = vmin.xlane.f32.xlu0 %v4761_v13  ;;  %v2624_v23 = vshra.s32 %v4765_v31, 16 }
 0x3f8   :  { %v2406_v55 = vpop.xlane.xlu1 %2405  ;;  %v2638_v25 = vshra.s32 %v4769_v21, 16 }
 0x3f9   :  { %vm2424_vm4 = vcmp.ge.f32.partialorder %v4663_v59, %v2406_v55  ;;  %v4775_v8 = vcvt.s32.f32 %v2624_v23  ;;  %v2455_v59 = vand.u32 65535, %v4670_v15  ;;  %v2485_v15 = vcvt.s32.f32 %v2483_v63 }
 0x3fa   :  { %v4781_v39 = vsel %vm2424_vm4, %v4667_v50, 128  ;;  %v4788_v34 = vcvt.s32.f32 %v2638_v25 }
 0x3fb   :  { %2627 = vmin.xlane.f32.xlu1 %v4775_v8  ;;  %2613 = vmin.xlane.f32.xlu0 %v4777_v7  ;;  %v2652_v38 = vshra.s32 %v4781_v39, 16  ;;  %v2457_v20 = vcvt.s32.f32 %v2455_v59 }
 0x3fd   :  { %v4786_v6 = vcvt.s32.f32 %v2652_v38 }
 0x3ff   :  { %2655 = vmin.xlane.f32.xlu1 %v4786_v6  ;;  %2641 = vmin.xlane.f32.xlu0 %v4788_v34 }
 0x46b   :  { %v4794_v12 = vpop.xlane.xlu1 %2459 }
 0x46c   :  { %vm2461_vm11 = vcmp.eq.f32.partialorder %v4673_v53, %v4794_v12  ;;  %v2497_v53 = vand.u32 65535, %v4693_v11 }
 0x46d   :  { %v2462_v58 = vsel %vm2461_vm11, %v2457_v20, inf }
 0x46e   :  { %2463 = vmin.xlane.f32.xlu1 %v2462_v58  ;;  %v2499_v11 = vcvt.s32.f32 %v2497_v53 }
 0x46f   :  { %v4799_v56 = vpop.xlane.xlu0 %2445 }
 0x470   :  { %v4802_v48 = vpop.xlane.xlu1 %2487  ;;  %vm2447_vm2 = vcmp.eq.f32.partialorder %v4684_v49, %v4799_v56  ;;  %v2525_v49 = vand.u32 65535, %v4706_v0  ;;  %v2553_v0 = vand.u32 65535, %v4721_v22  ;;  %v2581_v22 = vand.u32 65535, %v4737_v10 }
 0x471   :  { %vm2489_vm5 = vcmp.eq.f32.partialorder %v4686_v62, %v4802_v48  ;;  %v2448_v60 = vsel %vm2447_vm2, %v2443_v35, inf  ;;  %v2539_v62 = vand.u32 65535, %v4717_v24  ;;  %v2567_v24 = vand.u32 65535, %v4733_v42 }
 0x472   :  { %v2490_v5 = vsel %vm2489_vm5, %v2485_v15, inf  ;;  %2449 = vmin.xlane.f32.xlu0 %v2448_v60  ;;  %v2527_v18 = vcvt.s32.f32 %v2525_v49  ;;  %v2595_v42 = vand.u32 65535, %v4749_v4  ;;  %v2555_v14 = vcvt.s32.f32 %v2553_v0 }
 0x473   :  { %2491 = vmin.xlane.f32.xlu1 %v2490_v5  ;;  %v2541_v16 = vcvt.s32.f32 %v2539_v62  ;;  %v2569_v33 = vcvt.s32.f32 %v2567_v24  ;;  %v2609_v10 = vand.u32 65535, %v4753_v2  ;;  %v2623_v4 = vand.u32 65535, %v4765_v31 }
 0x474   :  { %v4810_v51 = vpop.xlane.xlu0 %2473  ;;  %v2597_v23 = vcvt.s32.f32 %v2595_v42  ;;  %v2583_v55 = vcvt.s32.f32 %v2581_v22  ;;  %v2637_v2 = vand.u32 65535, %v4769_v21  ;;  %v2651_v31 = vand.u32 65535, %v4781_v39 }
 0x475   :  { %vm2475_vm12 = vcmp.eq.f32.partialorder %v4698_v43, %v4810_v51  ;;  %v2625_v59 = vcvt.s32.f32 %v2623_v4  ;;  %v2611_v54 = vcvt.s32.f32 %v2609_v10  ;;  %v2466_v35 = vcvt.f32.s32 %v4794_v12 }
 0x476   :  { %v2476_v46 = vsel %vm2475_vm12, %v2471_v29, inf  ;;  %v2653_v39 = vcvt.s32.f32 %v2651_v31  ;;  %v2639_v63 = vcvt.s32.f32 %v2637_v2  ;;  %v2452_v27 = vcvt.f32.s32 %v4799_v56 }
 0x477   :  { %2477 = vmin.xlane.f32.xlu0 %v2476_v46  ;;  %v2494_v15 = vcvt.f32.s32 %v4802_v48  ;;  %v2480_v60 = vcvt.f32.s32 %v4810_v51  ;;  %v4885_v56 = vadd.s32 4294967272, %v4667_v50  ;;  %v2467_v48 = vshll.u32 %v2466_v35, 16 }
 0x478   :  { %v4816_v47 = vpop.xlane.xlu1 %2515  ;;  %v4818_v28 = vpop.xlane.xlu0 %2501  ;;  %v2453_v51 = vshll.u32 %v2452_v27, 16  ;;  %v2708_v24 = vadd.s32 4294967280, %v4667_v50  ;;  %vm2706_vm2 = vcmask 130112   ;;  %vm2713_vm5 = vcmask 195712  }
 0x479   :  { %vm2517_vm13 = vcmp.eq.f32.partialorder %v4711_v40, %v4816_v47  ;;  %vm2503_vm6 = vcmp.eq.f32.partialorder %v4713_v30, %v4818_v28  ;;  %v2522_v5 = vcvt.f32.s32 %v4816_v47  ;;  %v2495_v47 = vshll.u32 %v2494_v15, 16 }
 0x47a   :  { %v2518_v37 = vsel %vm2517_vm13, %v2513_v45, inf  ;;  %v2504_v43 = vsel %vm2503_vm6, %v2499_v11, inf  ;;  %v2711_v10 = vsub.s32 %v2708_v24, %v3647_v17  ;;  %v2722_v2 = vadd.s32 4294967264, %v4667_v50 }
 0x47b   :  { %2519 = vmin.xlane.f32.xlu1 %v2518_v37  ;;  %2505 = vmin.xlane.f32.xlu0 %v2504_v43  ;;  %v2523_v45 = vshll.u32 %v2522_v5, 16  ;;  %vm2720_vm6 = vcmask 261312  }
 0x47c   :  { %v4826_v3 = vpop.xlane.xlu1 %2543  ;;  %v4828_v9 = vpop.xlane.xlu0 %2529 }
 0x47d   :  { %vm2545_vm15 = vcmp.eq.f32.partialorder %v4727_v26, %v4826_v3  ;;  %vm2531_vm0 = vcmp.eq.f32.partialorder %v4729_v41, %v4828_v9  ;;  %v2536_v36 = vcvt.f32.s32 %v4828_v9 }
 0x47e   :  { %v2546_v40 = vsel %vm2545_vm15, %v2541_v16, inf  ;;  %v2532_v30 = vsel %vm2531_vm0, %v2527_v18, inf  ;;  %v2718_v18 = vsub.s32 %v4885_v56, %v3647_v17  ;;  %vm2727_vm15 = vcmask 326912  }
 0x47f   :  { %2547 = vmin.xlane.f32.xlu1 %v2546_v40  ;;  %2533 = vmin.xlane.f32.xlu0 %v2532_v30 }
 0x480   :  { %v4836_v61 = vpop.xlane.xlu1 %2571  ;;  %v4838_v1 = vpop.xlane.xlu0 %2557 }
 0x481   :  { %vm2573_vm7 = vcmp.eq.f32.partialorder %v4743_v44, %v4836_v61  ;;  %vm2559_vm3 = vcmp.eq.f32.partialorder %v4745_v19, %v4838_v1  ;;  %v2578_v29 = vcvt.f32.s32 %v4836_v61  ;;  %v2564_v12 = vcvt.f32.s32 %v4838_v1 }
 0x482   :  { %v2574_v26 = vsel %vm2573_vm7, %v2569_v33, inf  ;;  %v2560_v41 = vsel %vm2559_vm3, %v2555_v14, inf  ;;  %vm2734_vm7 = vcmask 392512   ;;  %vm2741_vm3 = vcmask 458112  }
 0x483   :  { %2575 = vmin.xlane.f32.xlu1 %v2574_v26  ;;  %2561 = vmin.xlane.f32.xlu0 %v2560_v41  ;;  %v4894_v9 = vshll.u32 %v2578_v29, 16  ;;  %v4896_v16 = vshll.u32 %v2564_v12, 16  ;;  %v2699_v26 = vsub.s32 %v4667_v50, %v3647_v17  ;;  %v2757_v12 = vadd.s32 4294967224, %v4667_v50 }
 0x484   :  { %v4846_v32 = vpop.xlane.xlu1 %2599  ;;  %v4848_v57 = vpop.xlane.xlu0 %2585 }
 0x485   :  { %vm2601_vm8 = vcmp.eq.f32.partialorder %v4759_v52, %v4846_v32  ;;  %vm2587_vm10 = vcmp.eq.f32.partialorder %v4761_v13, %v4848_v57  ;;  %v2606_v49 = vcvt.f32.s32 %v4846_v32  ;;  %v2592_v11 = vcvt.f32.s32 %v4848_v57 }
 0x486   :  { %v2602_v44 = vsel %vm2601_vm8, %v2597_v23, inf  ;;  %v2588_v19 = vsel %vm2587_vm10, %v2583_v55, inf  ;;  %vm2748_vm8 = vcmask 523712  }
 0x487   :  { %2603 = vmin.xlane.f32.xlu1 %v2602_v44  ;;  %2589 = vmin.xlane.f32.xlu0 %v2588_v19  ;;  %v4900_v30 = vshll.u32 %v2606_v49, 16  ;;  %v4903_v1 = vshll.u32 %v2592_v11, 16  ;;  %v2729_v19 = vadd.s32 4294967256, %v4667_v50  ;;  %v4931_v49 = vadd.s32 4294967208, %v4667_v50 }
 0x488   :  { %v4856_v25 = vpop.xlane.xlu1 %2627  ;;  %v4858_v38 = vpop.xlane.xlu0 %2613 }
 0x489   :  { %vm2629_vm9 = vcmp.eq.f32.partialorder %v4775_v8, %v4856_v25  ;;  %vm2615_vm1 = vcmp.eq.f32.partialorder %v4777_v7, %v4858_v38  ;;  %v2701_v7 = vadd.s32 4294967288, %v4667_v50  ;;  %v2634_v22 = vcvt.f32.s32 %v4856_v25 }
 0x48a   :  { %v2630_v52 = vsel %vm2629_vm9, %v2625_v59, inf  ;;  %v2616_v13 = vsel %vm2615_vm1, %v2611_v54, inf  ;;  %v2620_v33 = vcvt.f32.s32 %v4858_v38  ;;  %v2743_v59 = vadd.s32 4294967240, %v4667_v50 }
 0x48b   :  { %2631 = vmin.xlane.f32.xlu1 %v2630_v52  ;;  %2617 = vmin.xlane.f32.xlu0 %v2616_v13  ;;  %v2704_v53 = vsub.s32 %v2701_v7, %v3647_v17  ;;  %v4911_v55 = vshll.u32 %v2634_v22, 16  ;;  %v2736_v13 = vadd.s32 4294967248, %v4667_v50  ;;  %v2725_v7 = vsub.s32 %v2722_v2, %v3647_v17 }
 0x48c   :  { %v4864_v20 = vpop.xlane.xlu1 %2655  ;;  %v4866_v21 = vpop.xlane.xlu0 %2641  ;;  %v4915_v31 = vshll.u32 %v2620_v33, 16  ;;  %vm2755_vm1 = vcmask 589312  }
 0x48d   :  { %vm2657_vm14 = vcmp.eq.f32.partialorder %v4786_v6, %v4864_v20  ;;  %vm2643_vm4 = vcmp.eq.f32.partialorder %v4788_v34, %v4866_v21  ;;  %v2508_v6 = vcvt.f32.s32 %v4818_v28  ;;  %v2550_v34 = vcvt.f32.s32 %v4826_v3 }
 0x48e   :  { %v2658_v8 = vsel %vm2657_vm14, %v2653_v39, inf  ;;  %v2644_v58 = vsel %vm2643_vm4, %v2639_v63, inf  ;;  %v2481_v28 = vshll.u32 %v2480_v60, 16  ;;  %v4892_v3 = vshll.u32 %v2536_v36, 16 }
 0x48f   :  { %2659 = vmin.xlane.f32.xlu1 %v2658_v8  ;;  %2645 = vmin.xlane.f32.xlu0 %v2644_v58  ;;  %v2509_v37 = vshll.u32 %v2508_v6, 16  ;;  %v4889_v43 = vshll.u32 %v2550_v34, 16  ;;  %v2662_v4 = vcvt.f32.s32 %v4864_v20  ;;  %v2648_v32 = vcvt.f32.s32 %v4866_v21 }
 0x490   :  { %v2732_v8 = vsub.s32 %v2729_v19, %v3647_v17  ;;  %v2746_v6 = vsub.s32 %v2743_v59, %v3647_v17  ;;  %v2739_v34 = vsub.s32 %v2736_v13, %v3647_v17  ;;  %v2785_v59 = vadd.s32 4294967192, %v4667_v50 }
 0x491   :  { %v4919_v20 = vshll.u32 %v2662_v4, 16  ;;  %v4921_v21 = vshll.u32 %v2648_v32, 16 }
 0x4fb   :  { %v2464_v46 = vpop.xlane.xlu1 %2463 }
 0x4fc   :  { %v2465_v62 = vcvt.f32.s32 %v2464_v46 }
 0x4fe   :  { %v2468_v0 = vadd.s32 %v2467_v48, %v2465_v62 }
 0x4ff   :  { %v2450_v40 = vpop.xlane.xlu0 %2449 }
 0x500   :  { %vm2667_vm11 = vcmp.lt.s32.totalorder %v2468_v0, 127  ;;  %v2492_v42 = vpop.xlane.xlu1 %2491  ;;  %v2451_v61 = vcvt.f32.s32 %v2450_v40  ;;  %v2760_v40 = vsub.s32 %v2757_v12, %v3647_v17 }
 0x501   :  { %v2493_v14 = vcvt.f32.s32 %v2492_v42  ;;  %v2668_v57 = vsel %vm2667_vm11, %v2468_v0, 127  ;;  %vm2762_vm11 = vcmask 654912  }
 0x502   :  { %v2454_v41 = vadd.s32 %v2453_v51, %v2451_v61  ;;  %v2705_v54 = vrot.slane %v2668_v57, %v2704_v53  ;;  %v2750_v51 = vadd.s32 4294967232, %v4667_v50 }
 0x503   :  { %v2496_v23 = vadd.s32 %v2495_v47, %v2493_v14  ;;  %v2774_v14 = vsub.s32 %v4931_v49, %v3647_v17 }
 0x504   :  { %vm2665_vm12 = vcmp.lt.s32.totalorder %v2454_v41, 127  ;;  %v2478_v44 = vpop.xlane.xlu0 %2477  ;;  %v2753_v61 = vsub.s32 %v2750_v51, %v3647_v17 }
 0x505   :  { %v2666_v25 = vsel %vm2665_vm12, %v2454_v41, 127  ;;  %v2479_v38 = vcvt.f32.s32 %v2478_v44  ;;  %vm2671_vm13 = vcmp.lt.s32.totalorder %v2496_v23, 127 }
 0x506   :  { %v2700_v52 = vrot.slane %v2666_v25, %v2699_v26  ;;  %v2672_v27 = vsel %vm2671_vm13, %v2496_v23, 127  ;;  %v2764_v26 = vadd.s32 4294967216, %v4667_v50  ;;  %vm2776_vm13 = vcmask 786112  }
 0x507   :  { %v2482_v39 = vadd.s32 %v2481_v28, %v2479_v38  ;;  %v2719_v46 = vrot.slane %v2672_v27, %v2718_v18  ;;  %v2788_v27 = vsub.s32 %v2785_v59, %v3647_v17 }
 0x508   :  { %v2707_v63 = vsel %vm2706_vm2, %v2705_v54, %v2700_v52  ;;  %v2520_v58 = vpop.xlane.xlu1 %2519  ;;  %v2506_v35 = vpop.xlane.xlu0 %2505  ;;  %v2767_v25 = vsub.s32 %v2764_v26, %v3647_v17  ;;  %vm2769_vm2 = vcmask 720512  }
 0x509   :  { %vm2669_vm0 = vcmp.lt.s32.totalorder %v2482_v39, 127  ;;  %v2521_v15 = vcvt.f32.s32 %v2520_v58  ;;  %v2507_v60 = vcvt.f32.s32 %v2506_v35 }
 0x50a   :  { %v2670_v5 = vsel %vm2669_vm0, %v2482_v39, 127  ;;  %vm2783_vm0 = vcmask 851712  }
 0x50b   :  { %v2712_v53 = vrot.slane %v2670_v5, %v2711_v10  ;;  %v2524_v36 = vadd.s32 %v2523_v45, %v2521_v15  ;;  %v2510_v29 = vadd.s32 %v2509_v37, %v2507_v60  ;;  %v2799_v5 = vadd.s32 4294967176, %v4667_v50 }
 0x50c   :  { %v2548_v56 = vpop.xlane.xlu1 %2547  ;;  %v2534_v48 = vpop.xlane.xlu0 %2533 }
 0x50d   :  { %v2714_v62 = vsel %vm2713_vm5, %v2712_v53, %v2707_v63  ;;  %vm2675_vm10 = vcmp.lt.s32.totalorder %v2524_v36, 127  ;;  %vm2673_vm9 = vcmp.lt.s32.totalorder %v2510_v29, 127  ;;  %v2549_v47 = vcvt.f32.s32 %v2548_v56 }
 0x50e   :  { %v2676_v28 = vsel %vm2675_vm10, %v2524_v36, 127  ;;  %v2721_v45 = vsel %vm2720_vm6, %v2719_v46, %v2714_v62  ;;  %v2674_v11 = vsel %vm2673_vm9, %v2510_v29, 127  ;;  %v2535_v37 = vcvt.f32.s32 %v2534_v48 }
 0x50f   :  { %v2733_v0 = vrot.slane %v2676_v28, %v2732_v8  ;;  %v2726_v24 = vrot.slane %v2674_v11, %v2725_v7  ;;  %v2552_v18 = vadd.s32 %v4889_v43, %v2549_v47  ;;  %v2802_v51 = vsub.s32 %v2799_v5, %v3647_v17 }
 0x510   :  { %v2538_v22 = vadd.s32 %v4892_v3, %v2535_v37  ;;  %v2576_v42 = vpop.xlane.xlu1 %2575  ;;  %v2562_v33 = vpop.xlane.xlu0 %2561  ;;  %v2792_v62 = vadd.s32 4294967184, %v4667_v50 }
 0x511   :  { %v2728_v41 = vsel %vm2727_vm15, %v2726_v24, %v2721_v45  ;;  %vm2679_vm14 = vcmp.lt.s32.totalorder %v2552_v18, 127  ;;  %v2577_v10 = vcvt.f32.s32 %v2576_v42  ;;  %v2563_v4 = vcvt.f32.s32 %v2562_v33 }
 0x512   :  { %v2680_v32 = vsel %vm2679_vm14, %v2552_v18, 127  ;;  %v2735_v43 = vsel %vm2734_vm7, %v2733_v0, %v2728_v41  ;;  %vm2677_vm4 = vcmp.lt.s32.totalorder %v2538_v22, 127  ;;  %vm2804_vm14 = vcmask 1048512  }
 0x513   :  { %v2747_v3 = vrot.slane %v2680_v32, %v2746_v6  ;;  %v2678_v57 = vsel %vm2677_vm4, %v2538_v22, 127  ;;  %v2580_v23 = vadd.s32 %v4894_v9, %v2577_v10  ;;  %v2566_v44 = vadd.s32 %v4896_v16, %v2563_v4 }
 0x514   :  { %v2740_v19 = vrot.slane %v2678_v57, %v2739_v34  ;;  %v2604_v2 = vpop.xlane.xlu1 %2603  ;;  %v2590_v38 = vpop.xlane.xlu0 %2589  ;;  %v2778_v9 = vadd.s32 4294967200, %v4667_v50 }
 0x515   :  { %vm2683_vm5 = vcmp.lt.s32.totalorder %v2580_v23, 127  ;;  %vm2681_vm12 = vcmp.lt.s32.totalorder %v2566_v44, 127  ;;  %v2605_v54 = vcvt.f32.s32 %v2604_v2  ;;  %v2591_v52 = vcvt.f32.s32 %v2590_v38 }
 0x516   :  { %v2742_v13 = vsel %vm2741_vm3, %v2740_v19, %v2735_v43  ;;  %v2684_v39 = vsel %vm2683_vm5, %v2580_v23, 127  ;;  %v2682_v63 = vsel %vm2681_vm12, %v2566_v44, 127 }
 0x517   :  { %v2761_v8 = vrot.slane %v2684_v39, %v2760_v40  ;;  %v2749_v16 = vsel %vm2748_vm8, %v2747_v3, %v2742_v13  ;;  %v2754_v58 = vrot.slane %v2682_v63, %v2753_v61  ;;  %v2608_v7 = vadd.s32 %v4900_v30, %v2605_v54 }
 0x518   :  { %v2594_v35 = vadd.s32 %v4903_v1, %v2591_v52  ;;  %v2632_v15 = vpop.xlane.xlu1 %2631  ;;  %v2618_v60 = vpop.xlane.xlu0 %2617  ;;  %v2781_v30 = vsub.s32 %v2778_v9, %v3647_v17  ;;  %vm2790_vm8 = vcmask 917312   ;;  %v2795_v40 = vsub.s32 %v2792_v62, %v3647_v17 }
 0x519   :  { %v2756_v6 = vsel %vm2755_vm1, %v2754_v58, %v2749_v16  ;;  %vm2687_vm6 = vcmp.lt.s32.totalorder %v2608_v7, 127  ;;  %v2633_v34 = vcvt.f32.s32 %v2632_v15  ;;  %v2619_v53 = vcvt.f32.s32 %v2618_v60 }
 0x51a   :  { %v2688_v36 = vsel %vm2687_vm6, %v2608_v7, 127  ;;  %v2763_v29 = vsel %vm2762_vm11, %v2761_v8, %v2756_v6  ;;  %vm2685_vm15 = vcmp.lt.s32.totalorder %v2594_v35, 127  ;;  %vm2797_vm1 = vcmask 982912  }
 0x51b   :  { %v2775_v12 = vrot.slane %v2688_v36, %v2774_v14  ;;  %v2686_v1 = vsel %vm2685_vm15, %v2594_v35, 127  ;;  %v2636_v46 = vadd.s32 %v4911_v55, %v2633_v34  ;;  %v2622_v56 = vadd.s32 %v4915_v31, %v2619_v53 }
 0x51c   :  { %v2768_v48 = vrot.slane %v2686_v1, %v2767_v25  ;;  %v2660_v49 = vpop.xlane.xlu1 %2659  ;;  %v2646_v47 = vpop.xlane.xlu0 %2645 }
 0x51d   :  { %vm2691_vm7 = vcmp.lt.s32.totalorder %v2636_v46, 127  ;;  %vm2689_vm3 = vcmp.lt.s32.totalorder %v2622_v56, 127  ;;  %v2661_v28 = vcvt.f32.s32 %v2660_v49  ;;  %v2647_v45 = vcvt.f32.s32 %v2646_v47 }
 0x51e   :  { %v2770_v11 = vsel %vm2769_vm2, %v2768_v48, %v2763_v29  ;;  %v2692_v37 = vsel %vm2691_vm7, %v2636_v46, 127  ;;  %v2690_v0 = vsel %vm2689_vm3, %v2622_v56, 127 }
 0x51f   :  { %v2789_v55 = vrot.slane %v2692_v37, %v2788_v27  ;;  %v2777_v31 = vsel %vm2776_vm13, %v2775_v12, %v2770_v11  ;;  %v2782_v24 = vrot.slane %v2690_v0, %v2781_v30  ;;  %v2664_v18 = vadd.s32 %v4919_v20, %v2661_v28 }
 0x520   :  { %v2650_v50 = vadd.s32 %v4921_v21, %v2647_v45 }
 0x521   :  { %v2784_v22 = vsel %vm2783_vm0, %v2782_v24, %v2777_v31  ;;  %vm2695_vm10 = vcmp.lt.s32.totalorder %v2664_v18, 127 }
 0x522   :  { %v2696_v42 = vsel %vm2695_vm10, %v2664_v18, 127  ;;  %v2791_v61 = vsel %vm2790_vm8, %v2789_v55, %v2784_v22  ;;  %vm2693_vm9 = vcmp.lt.s32.totalorder %v2650_v50, 127 }
 0x523   :  { %v2803_v33 = vrot.slane %v2696_v42, %v2802_v51  ;;  %v2694_v14 = vsel %vm2693_vm9, %v2650_v50, 127 }
 0x524   :  { %v2796_v26 = vrot.slane %v2694_v14, %v2795_v40 }
 0x526   :  { %v2798_v41 = vsel %vm2797_vm1, %v2796_v26, %v2791_v61 }
 0x527   :  { %v2805_v10 = vsel %vm2804_vm14, %v2803_v33, %v2798_v41 }
 0x528   :  { %2806 = vst [vmem:[%s4978_s7] sm:$0x1] %v2805_v10 }

</bundles_post_ra>
